<compile_context>
chip_gen: v5e
topology: v5e:2x2
jax: 0.10.0
libtpu: 0.0.40
codegen_flags: <defaults>
</compile_context>

<pallas_src>
import jax
import jax.numpy as jnp
from jax.experimental import pallas as pl
from jax.experimental.pallas import tpu as pltpu

# ---- module-level constants of the original repo (small synthetic values) ----
dimR = 8              # number of relations (output classes / relation-embedding vocab)
Encodered_dim = 64    # sentence-encoder output dim
Att_dropout = 0.5     # nn.Dropout prob (identity in eval mode)


def _monore_kernel(relation_ref, inp_ref, segm_ref, rvec_ref, mwt_ref, mb_ref,
                   sel_ref, o_ref):
    # relation_ref: (NumRe, T, E)   gathered relation embeddings per (relation, sentence)
    # inp_ref:      (T, E)          sentence encodings
    # segm_ref:     (NumIn, T)      f32 {0,1} segment mask (bag i covers its sentences)
    # rvec_ref:     (NumIn, NumRe, E)  R_vec (relation emb at each bag's first sentence)
    # mwt_ref:      (E, dimR)       Linear weight, pre-transposed
    # mb_ref:       (1, dimR)       Linear bias
    # sel_ref:      (NumIn, NumRe, dimR)  one-hot float re_mask
    # o_ref:        (NumRe, NumIn)  output (transposed; wrapper returns o.T)
    num_in = segm_ref.shape[0]

    rel = relation_ref[...]                                   # (NumRe, T, E)
    x = inp_ref[...]                                          # (T, E)
    mwt = mwt_ref[...]                                        # (E, dimR)
    mb = mb_ref[...]                                          # (1, dimR)

    # attn[j, t] = <relation_emb[r[j, t]], inp[t]>
    attn = jnp.sum(rel * x[None, :, :], axis=2)               # (NumRe, T)

    for i in range(num_in):                                   # static unroll over bags
        m = segm_ref[i:i + 1, :]                              # (1, T) in {0,1}
        # masked softmax over this bag's sentences (empty bag -> all-zero Att)
        neg = attn * m - 1e30 * (1.0 - m)                     # (NumRe, T)
        mx = jnp.max(neg, axis=1, keepdims=True)              # (NumRe, 1)
        e = jnp.exp(neg - mx) * m                             # (NumRe, T)
        den = jnp.sum(e, axis=1, keepdims=True)               # (NumRe, 1)
        att = e / jnp.maximum(den, 1e-30)                     # (NumRe, T)

        # S[i] = Att @ inp  (MXU)
        # TODO(synk): nn.Dropout(p=Att_dropout) on S is eval-mode identity here.
        s = jnp.dot(att, x, preferred_element_type=jnp.float32)    # (NumRe, E)

        rvec = rvec_ref[i]                                    # (NumRe, E)
        logits = (jnp.dot(s, mwt, preferred_element_type=jnp.float32)
                  + mb
                  + jnp.sum(rvec * s, axis=1, keepdims=True))  # (NumRe, dimR)

        # log_softmax over dimR
        lmax = jnp.max(logits, axis=1, keepdims=True)
        lse = lmax + jnp.log(jnp.sum(jnp.exp(logits - lmax), axis=1, keepdims=True))
        p_n = logits - lse                                    # (NumRe, dimR)

        # p_n[re_mask] for this bag: one-hot select per relation -> (NumRe, 1) column
        o_ref[:, i:i + 1] = jnp.sum(p_n * sel_ref[i], axis=1, keepdims=True)


def monore_forward(params, inp, r, l, re_mask):
    """MonoRE.forward (eval mode).

    inp:     (T, Encodered_dim) f32   sentence encodings (bags are contiguous segments)
    r:       (NumRe, T) int32         relation ids per (relation-slot, sentence)
    l:       (NumIn,) int32           bag lengths (sum == T; zeros allowed)
    re_mask: (NumIn, NumRe, dimR) bool  exactly one True per (i, j)
    returns: (NumIn, NumRe) f32
    """
    NumRe, T = r.shape
    NumIn = l.shape[0]
    E = inp.shape[1]

    # --- glue: embedding gathers + segment bookkeeping (plain JAX) ---
    relation = jnp.take(params["relation_emb"], r, axis=0)           # (NumRe, T, E)

    l = l.astype(jnp.int32)
    starts = jnp.concatenate(
        [jnp.zeros((1,), jnp.int32), jnp.cumsum(l)[:-1].astype(jnp.int32)])  # (NumIn,)
    t_idx = jnp.arange(T, dtype=jnp.int32)[None, :]                   # (1, T)
    seg_mask = ((t_idx >= starts[:, None]) &
                (t_idx < (starts + l)[:, None])).astype(jnp.float32)  # (NumIn, T)

    # R_vec[i] = relation[:, L_i, :] (zero for empty bags, matching the original code)
    r_at_start = r[:, jnp.clip(starts, 0, T - 1)]                     # (NumRe, NumIn)
    rvec = jnp.take(params["relation_emb"], r_at_start, axis=0)       # (NumRe, NumIn, E)
    rvec = jnp.transpose(rvec, (1, 0, 2))                             # (NumIn, NumRe, E)
    rvec = jnp.where((l > 0)[:, None, None], rvec, 0.0).astype(jnp.float32)

    sel = re_mask.astype(jnp.float32)                                 # (NumIn, NumRe, dimR)
    mwt = params["M_w"].T                                             # (E, dimR)
    mb = params["M_b"].reshape(1, dimR)                               # (1, dimR)

    out_t = pl.pallas_call(
        _monore_kernel,
        out_shape=jax.ShapeDtypeStruct((NumRe, NumIn), jnp.float32),
        grid=(1,),
        in_specs=[
            pl.BlockSpec((NumRe, T, E), lambda i: (0, 0, 0)),
            pl.BlockSpec((T, E), lambda i: (0, 0)),
            pl.BlockSpec((NumIn, T), lambda i: (0, 0)),
            pl.BlockSpec((NumIn, NumRe, E), lambda i: (0, 0, 0)),
            pl.BlockSpec((E, dimR), lambda i: (0, 0)),
            pl.BlockSpec((1, dimR), lambda i: (0, 0)),
            pl.BlockSpec((NumIn, NumRe, dimR), lambda i: (0, 0, 0)),
        ],
        out_specs=pl.BlockSpec((NumRe, NumIn), lambda i: (0, 0)),
        compiler_params=pltpu.CompilerParams(dimension_semantics=("arbitrary",)),
    )(relation, inp, seg_mask, rvec, mwt, mb, sel)
    return out_t.T                                                    # (NumIn, NumRe)


def monore_reference(params, inp, r, l, re_mask):
    """Pure-JAX/NumPy reference mirroring the PyTorch loop exactly (eval mode)."""
    import numpy as np
    NumRe, T = r.shape
    NumIn = l.shape[0]
    E = inp.shape[1]
    relation = params["relation_emb"][r]                              # (NumRe, T, E)
    attn = jnp.sum(relation * inp[None, :, :], axis=2)                # (NumRe, T)
    S = np.zeros((NumIn, NumRe, E), np.float32)
    R_vec = np.zeros((NumIn, NumRe, E), np.float32)
    l_host = np.asarray(l)
    L = 0
    for i in range(NumIn):
        R = L + int(l_host[i])
        if R > L:
            Att = jax.nn.softmax(attn[:, L:R], axis=1)
            S[i] = np.asarray(Att @ inp[L:R])
            R_vec[i] = np.asarray(relation[:, L, :])
        L = R
    S = jnp.asarray(S)
    R_vec = jnp.asarray(R_vec)
    logits = (S @ params["M_w"].T + params["M_b"]
              + jnp.sum(R_vec * S, axis=2, keepdims=True))
    p_n = jax.nn.log_softmax(logits, axis=2)
    return jnp.sum(p_n * re_mask.astype(jnp.float32), axis=2)


def init_monore_params(key):
    k1, k2, k3 = jax.random.split(key, 3)
    return {
        "relation_emb": jax.random.normal(k1, (dimR, Encodered_dim), jnp.float32) * 0.1,
        # PyTorch Linear(Encodered_dim, dimR): weight (dimR, E), bias (dimR,)
        "M_w": jax.random.normal(k2, (dimR, Encodered_dim), jnp.float32) * 0.1,
        "M_b": jax.random.normal(k3, (dimR,), jnp.float32) * 0.1,
    }


if __name__ == "__main__":
    key = jax.random.PRNGKey(0)
    kp, kd = jax.random.split(key)
    params = init_monore_params(kp)

    # Small synthetic instance: 4 bags (one empty) over T=8 sentences, NumRe = dimR = 8.
    NumIn = 4
    l = jnp.array([3, 0, 2, 3], dtype=jnp.int32)
    T = int(jnp.sum(l))
    NumRe = dimR

    kd1, kd2, kd3 = jax.random.split(kd, 3)
    inp = jax.random.normal(kd1, (T, Encodered_dim), jnp.float32)
    r = jax.random.randint(kd2, (NumRe, T), 0, dimR, dtype=jnp.int32)
    sel_idx = jax.random.randint(kd3, (NumIn, NumRe), 0, dimR, dtype=jnp.int32)
    re_mask = jax.nn.one_hot(sel_idx, dimR, dtype=jnp.float32) > 0.5   # (NumIn, NumRe, dimR)

    out = monore_forward(params, inp, r, l, re_mask)
    jax.block_until_ready(out)

    ref = monore_reference(params, inp, r, l, re_mask)
    assert out.shape == (NumIn, NumRe) and out.dtype == jnp.float32
    assert bool(jnp.all(jnp.isfinite(out)))
    max_err = float(jnp.max(jnp.abs(out - ref)))
    assert max_err < 2e-2, max_err
    print("KERNEL_OK")
</pallas_src>

<mosaic_0001>
module attributes {stable_mosaic.version = 11 : i64} {
  func.func @_monore_kernel(%arg0: i32, %arg1: memref<8x8x64xf32, #tpu.memory_space<vmem>>, %arg2: memref<8x64xf32, #tpu.memory_space<vmem>>, %arg3: memref<4x8xf32, #tpu.memory_space<vmem>>, %arg4: memref<4x8x64xf32, #tpu.memory_space<vmem>>, %arg5: memref<64x8xf32, #tpu.memory_space<vmem>>, %arg6: memref<1x8xf32, #tpu.memory_space<vmem>>, %arg7: memref<4x8x8xf32, #tpu.memory_space<vmem>>, %arg8: memref<8x4xf32, #tpu.memory_space<vmem>>) attributes {dimension_semantics = [#tpu.dimension_semantics<arbitrary>], iteration_bounds = array<i64: 1>, scalar_prefetch = 0 : i64, scratch_operands = 0 : i64, tpu.core_type = #tpu.core_type<tc>, window_params = [{pipeline_mode = #tpu.pipeline_mode<synchronous>, transform_indices = @transform_0, window_bounds = array<i64: 8, 8, 64>}, {pipeline_mode = #tpu.pipeline_mode<synchronous>, transform_indices = @transform_1, window_bounds = array<i64: 8, 64>}, {pipeline_mode = #tpu.pipeline_mode<synchronous>, transform_indices = @transform_2, window_bounds = array<i64: 4, 8>}, {pipeline_mode = #tpu.pipeline_mode<synchronous>, transform_indices = @transform_3, window_bounds = array<i64: 4, 8, 64>}, {pipeline_mode = #tpu.pipeline_mode<synchronous>, transform_indices = @transform_4, window_bounds = array<i64: 64, 8>}, {pipeline_mode = #tpu.pipeline_mode<synchronous>, transform_indices = @transform_5, window_bounds = array<i64: 1, 8>}, {pipeline_mode = #tpu.pipeline_mode<synchronous>, transform_indices = @transform_6, window_bounds = array<i64: 4, 8, 8>}, {pipeline_mode = #tpu.pipeline_mode<synchronous>, transform_indices = @transform_7, window_bounds = array<i64: 8, 4>}]} {
    %c0 = arith.constant 0 : index
    %c0_0 = arith.constant 0 : index
    %c0_1 = arith.constant 0 : index
    %0 = vector.load %arg1[%c0, %c0_0, %c0_1] : memref<8x8x64xf32, #tpu.memory_space<vmem>>, vector<8x8x64xf32>
    %c0_2 = arith.constant 0 : index
    %c0_3 = arith.constant 0 : index
    %1 = vector.load %arg2[%c0_2, %c0_3] : memref<8x64xf32, #tpu.memory_space<vmem>>, vector<8x64xf32>
    %c0_4 = arith.constant 0 : index
    %c0_5 = arith.constant 0 : index
    %2 = vector.load %arg5[%c0_4, %c0_5] : memref<64x8xf32, #tpu.memory_space<vmem>>, vector<64x8xf32>
    %c0_6 = arith.constant 0 : index
    %c0_7 = arith.constant 0 : index
    %3 = vector.load %arg6[%c0_6, %c0_7] : memref<1x8xf32, #tpu.memory_space<vmem>>, vector<1x8xf32>
    %4 = vector.shape_cast %1 : vector<8x64xf32> to vector<1x8x64xf32>
    %5 = vector.broadcast %4 : vector<1x8x64xf32> to vector<8x8x64xf32>
    %6 = arith.mulf %0, %5 : vector<8x8x64xf32>
    %cst = arith.constant dense<0.000000e+00> : vector<8x8xf32>
    %7 = vector.multi_reduction <add>, %6, %cst [2] : vector<8x8x64xf32> to vector<8x8xf32>
    %c0_8 = arith.constant 0 : index
    %c0_9 = arith.constant 0 : index
    %8 = vector.load %arg3[%c0_8, %c0_9] : memref<4x8xf32, #tpu.memory_space<vmem>>, vector<1x8xf32>
    %9 = vector.broadcast %8 : vector<1x8xf32> to vector<8x8xf32>
    %10 = arith.mulf %7, %9 : vector<8x8xf32>
    %cst_10 = arith.constant 1.000000e+00 : f32
    %11 = vector.broadcast %cst_10 : f32 to vector<1x8xf32>
    %12 = arith.subf %11, %8 : vector<1x8xf32>
    %cst_11 = arith.constant 1.000000e+30 : f32
    %13 = vector.broadcast %cst_11 : f32 to vector<1x8xf32>
    %14 = arith.mulf %13, %12 : vector<1x8xf32>
    %15 = vector.broadcast %14 : vector<1x8xf32> to vector<8x8xf32>
    %16 = arith.subf %10, %15 : vector<8x8xf32>
    %cst_12 = arith.constant dense<0xFF800000> : vector<8xf32>
    %17 = vector.multi_reduction <maximumf>, %16, %cst_12 [1] : vector<8x8xf32> to vector<8xf32>
    %18 = vector.shape_cast %17 : vector<8xf32> to vector<8x1xf32>
    %19 = vector.broadcast %18 : vector<8x1xf32> to vector<8x8xf32>
    %20 = arith.subf %16, %19 : vector<8x8xf32>
    %21 = math.exp %20 : vector<8x8xf32>
    %22 = vector.broadcast %8 : vector<1x8xf32> to vector<8x8xf32>
    %23 = arith.mulf %21, %22 : vector<8x8xf32>
    %cst_13 = arith.constant dense<0.000000e+00> : vector<8xf32>
    %24 = vector.multi_reduction <add>, %23, %cst_13 [1] : vector<8x8xf32> to vector<8xf32>
    %25 = vector.shape_cast %24 : vector<8xf32> to vector<8x1xf32>
    %cst_14 = arith.constant 1.000000e-30 : f32
    %26 = vector.broadcast %cst_14 : f32 to vector<8x1xf32>
    %27 = arith.maximumf %25, %26 : vector<8x1xf32>
    %28 = vector.broadcast %27 : vector<8x1xf32> to vector<8x8xf32>
    %29 = arith.divf %23, %28 : vector<8x8xf32>
    %cst_15 = arith.constant dense<0.000000e+00> : vector<8x64xf32>
    %30 = tpu.matmul %29, %1, %cst_15 {dimension_numbers = #tpu.dot_dimension_numbers<[1], [0], [0], [1], [0, 0, 1, 1], [], []>} : vector<8x8xf32>, vector<8x64xf32>, vector<8x64xf32> -> vector<8x64xf32>
    %c0_16 = arith.constant 0 : index
    %c0_17 = arith.constant 0 : index
    %c0_18 = arith.constant 0 : index
    %31 = vector.load %arg4[%c0_16, %c0_17, %c0_18] : memref<4x8x64xf32, #tpu.memory_space<vmem>>, vector<1x8x64xf32>
    %32 = vector.shape_cast %31 : vector<1x8x64xf32> to vector<8x64xf32>
    %cst_19 = arith.constant dense<0.000000e+00> : vector<8x8xf32>
    %33 = tpu.matmul %30, %2, %cst_19 {dimension_numbers = #tpu.dot_dimension_numbers<[1], [0], [0], [1], [0, 0, 1, 1], [], []>} : vector<8x64xf32>, vector<64x8xf32>, vector<8x8xf32> -> vector<8x8xf32>
    %34 = vector.broadcast %3 : vector<1x8xf32> to vector<8x8xf32>
    %35 = arith.addf %33, %34 : vector<8x8xf32>
    %36 = arith.mulf %32, %30 : vector<8x64xf32>
    %cst_20 = arith.constant dense<0.000000e+00> : vector<8xf32>
    %37 = vector.multi_reduction <add>, %36, %cst_20 [1] : vector<8x64xf32> to vector<8xf32>
    %38 = vector.shape_cast %37 : vector<8xf32> to vector<8x1xf32>
    %39 = vector.broadcast %38 : vector<8x1xf32> to vector<8x8xf32>
    %40 = arith.addf %35, %39 : vector<8x8xf32>
    %cst_21 = arith.constant dense<0xFF800000> : vector<8xf32>
    %41 = vector.multi_reduction <maximumf>, %40, %cst_21 [1] : vector<8x8xf32> to vector<8xf32>
    %42 = vector.shape_cast %41 : vector<8xf32> to vector<8x1xf32>
    %43 = vector.broadcast %42 : vector<8x1xf32> to vector<8x8xf32>
    %44 = arith.subf %40, %43 : vector<8x8xf32>
    %45 = math.exp %44 : vector<8x8xf32>
    %cst_22 = arith.constant dense<0.000000e+00> : vector<8xf32>
    %46 = vector.multi_reduction <add>, %45, %cst_22 [1] : vector<8x8xf32> to vector<8xf32>
    %47 = vector.shape_cast %46 : vector<8xf32> to vector<8x1xf32>
    %48 = math.log %47 : vector<8x1xf32>
    %49 = arith.addf %42, %48 : vector<8x1xf32>
    %50 = vector.broadcast %49 : vector<8x1xf32> to vector<8x8xf32>
    %51 = arith.subf %40, %50 : vector<8x8xf32>
    %c0_23 = arith.constant 0 : index
    %c0_24 = arith.constant 0 : index
    %c0_25 = arith.constant 0 : index
    %52 = vector.load %arg7[%c0_23, %c0_24, %c0_25] : memref<4x8x8xf32, #tpu.memory_space<vmem>>, vector<1x8x8xf32>
    %53 = vector.shape_cast %52 : vector<1x8x8xf32> to vector<8x8xf32>
    %54 = arith.mulf %51, %53 : vector<8x8xf32>
    %cst_26 = arith.constant dense<0.000000e+00> : vector<8xf32>
    %55 = vector.multi_reduction <add>, %54, %cst_26 [1] : vector<8x8xf32> to vector<8xf32>
    %56 = vector.shape_cast %55 : vector<8xf32> to vector<8x1xf32>
    %c0_27 = arith.constant 0 : index
    %c0_28 = arith.constant 0 : index
    %57 = vector.load %arg8[%c0_27, %c0_28] : memref<8x4xf32, #tpu.memory_space<vmem>>, vector<8x1xf32>
    tpu.vector_store %arg8[%c0_27, %c0_28], %56 {strides = array<i32>} : memref<8x4xf32, #tpu.memory_space<vmem>>, vector<8x1xf32>,
    %c1 = arith.constant 1 : index
    %c0_29 = arith.constant 0 : index
    %58 = vector.load %arg3[%c1, %c0_29] : memref<4x8xf32, #tpu.memory_space<vmem>>, vector<1x8xf32>
    %59 = vector.broadcast %58 : vector<1x8xf32> to vector<8x8xf32>
    %60 = arith.mulf %7, %59 : vector<8x8xf32>
    %cst_30 = arith.constant 1.000000e+00 : f32
    %61 = vector.broadcast %cst_30 : f32 to vector<1x8xf32>
    %62 = arith.subf %61, %58 : vector<1x8xf32>
    %cst_31 = arith.constant 1.000000e+30 : f32
    %63 = vector.broadcast %cst_31 : f32 to vector<1x8xf32>
    %64 = arith.mulf %63, %62 : vector<1x8xf32>
    %65 = vector.broadcast %64 : vector<1x8xf32> to vector<8x8xf32>
    %66 = arith.subf %60, %65 : vector<8x8xf32>
    %cst_32 = arith.constant dense<0xFF800000> : vector<8xf32>
    %67 = vector.multi_reduction <maximumf>, %66, %cst_32 [1] : vector<8x8xf32> to vector<8xf32>
    %68 = vector.shape_cast %67 : vector<8xf32> to vector<8x1xf32>
    %69 = vector.broadcast %68 : vector<8x1xf32> to vector<8x8xf32>
    %70 = arith.subf %66, %69 : vector<8x8xf32>
    %71 = math.exp %70 : vector<8x8xf32>
    %72 = vector.broadcast %58 : vector<1x8xf32> to vector<8x8xf32>
    %73 = arith.mulf %71, %72 : vector<8x8xf32>
    %cst_33 = arith.constant dense<0.000000e+00> : vector<8xf32>
    %74 = vector.multi_reduction <add>, %73, %cst_33 [1] : vector<8x8xf32> to vector<8xf32>
    %75 = vector.shape_cast %74 : vector<8xf32> to vector<8x1xf32>
    %cst_34 = arith.constant 1.000000e-30 : f32
    %76 = vector.broadcast %cst_34 : f32 to vector<8x1xf32>
    %77 = arith.maximumf %75, %76 : vector<8x1xf32>
    %78 = vector.broadcast %77 : vector<8x1xf32> to vector<8x8xf32>
    %79 = arith.divf %73, %78 : vector<8x8xf32>
    %cst_35 = arith.constant dense<0.000000e+00> : vector<8x64xf32>
    %80 = tpu.matmul %79, %1, %cst_35 {dimension_numbers = #tpu.dot_dimension_numbers<[1], [0], [0], [1], [0, 0, 1, 1], [], []>} : vector<8x8xf32>, vector<8x64xf32>, vector<8x64xf32> -> vector<8x64xf32>
    %c1_36 = arith.constant 1 : index
    %c0_37 = arith.constant 0 : index
    %c0_38 = arith.constant 0 : index
    %81 = vector.load %arg4[%c1_36, %c0_37, %c0_38] : memref<4x8x64xf32, #tpu.memory_space<vmem>>, vector<1x8x64xf32>
    %82 = vector.shape_cast %81 : vector<1x8x64xf32> to vector<8x64xf32>
    %cst_39 = arith.constant dense<0.000000e+00> : vector<8x8xf32>
    %83 = tpu.matmul %80, %2, %cst_39 {dimension_numbers = #tpu.dot_dimension_numbers<[1], [0], [0], [1], [0, 0, 1, 1], [], []>} : vector<8x64xf32>, vector<64x8xf32>, vector<8x8xf32> -> vector<8x8xf32>
    %84 = vector.broadcast %3 : vector<1x8xf32> to vector<8x8xf32>
    %85 = arith.addf %83, %84 : vector<8x8xf32>
    %86 = arith.mulf %82, %80 : vector<8x64xf32>
    %cst_40 = arith.constant dense<0.000000e+00> : vector<8xf32>
    %87 = vector.multi_reduction <add>, %86, %cst_40 [1] : vector<8x64xf32> to vector<8xf32>
    %88 = vector.shape_cast %87 : vector<8xf32> to vector<8x1xf32>
    %89 = vector.broadcast %88 : vector<8x1xf32> to vector<8x8xf32>
    %90 = arith.addf %85, %89 : vector<8x8xf32>
    %cst_41 = arith.constant dense<0xFF800000> : vector<8xf32>
    %91 = vector.multi_reduction <maximumf>, %90, %cst_41 [1] : vector<8x8xf32> to vector<8xf32>
    %92 = vector.shape_cast %91 : vector<8xf32> to vector<8x1xf32>
    %93 = vector.broadcast %92 : vector<8x1xf32> to vector<8x8xf32>
    %94 = arith.subf %90, %93 : vector<8x8xf32>
    %95 = math.exp %94 : vector<8x8xf32>
    %cst_42 = arith.constant dense<0.000000e+00> : vector<8xf32>
    %96 = vector.multi_reduction <add>, %95, %cst_42 [1] : vector<8x8xf32> to vector<8xf32>
    %97 = vector.shape_cast %96 : vector<8xf32> to vector<8x1xf32>
    %98 = math.log %97 : vector<8x1xf32>
    %99 = arith.addf %92, %98 : vector<8x1xf32>
    %100 = vector.broadcast %99 : vector<8x1xf32> to vector<8x8xf32>
    %101 = arith.subf %90, %100 : vector<8x8xf32>
    %c1_43 = arith.constant 1 : index
    %c0_44 = arith.constant 0 : index
    %c0_45 = arith.constant 0 : index
    %102 = vector.load %arg7[%c1_43, %c0_44, %c0_45] : memref<4x8x8xf32, #tpu.memory_space<vmem>>, vector<1x8x8xf32>
    %103 = vector.shape_cast %102 : vector<1x8x8xf32> to vector<8x8xf32>
    %104 = arith.mulf %101, %103 : vector<8x8xf32>
    %cst_46 = arith.constant dense<0.000000e+00> : vector<8xf32>
    %105 = vector.multi_reduction <add>, %104, %cst_46 [1] : vector<8x8xf32> to vector<8xf32>
    %106 = vector.shape_cast %105 : vector<8xf32> to vector<8x1xf32>
    %c0_47 = arith.constant 0 : index
    %c1_48 = arith.constant 1 : index
    %107 = vector.load %arg8[%c0_47, %c1_48] : memref<8x4xf32, #tpu.memory_space<vmem>>, vector<8x1xf32>
    tpu.vector_store %arg8[%c0_47, %c1_48], %106 {strides = array<i32>} : memref<8x4xf32, #tpu.memory_space<vmem>>, vector<8x1xf32>,
    %c2 = arith.constant 2 : index
    %c0_49 = arith.constant 0 : index
    %108 = vector.load %arg3[%c2, %c0_49] : memref<4x8xf32, #tpu.memory_space<vmem>>, vector<1x8xf32>
    %109 = vector.broadcast %108 : vector<1x8xf32> to vector<8x8xf32>
    %110 = arith.mulf %7, %109 : vector<8x8xf32>
    %cst_50 = arith.constant 1.000000e+00 : f32
    %111 = vector.broadcast %cst_50 : f32 to vector<1x8xf32>
    %112 = arith.subf %111, %108 : vector<1x8xf32>
    %cst_51 = arith.constant 1.000000e+30 : f32
    %113 = vector.broadcast %cst_51 : f32 to vector<1x8xf32>
    %114 = arith.mulf %113, %112 : vector<1x8xf32>
    %115 = vector.broadcast %114 : vector<1x8xf32> to vector<8x8xf32>
    %116 = arith.subf %110, %115 : vector<8x8xf32>
    %cst_52 = arith.constant dense<0xFF800000> : vector<8xf32>
    %117 = vector.multi_reduction <maximumf>, %116, %cst_52 [1] : vector<8x8xf32> to vector<8xf32>
    %118 = vector.shape_cast %117 : vector<8xf32> to vector<8x1xf32>
    %119 = vector.broadcast %118 : vector<8x1xf32> to vector<8x8xf32>
    %120 = arith.subf %116, %119 : vector<8x8xf32>
    %121 = math.exp %120 : vector<8x8xf32>
    %122 = vector.broadcast %108 : vector<1x8xf32> to vector<8x8xf32>
    %123 = arith.mulf %121, %122 : vector<8x8xf32>
    %cst_53 = arith.constant dense<0.000000e+00> : vector<8xf32>
    %124 = vector.multi_reduction <add>, %123, %cst_53 [1] : vector<8x8xf32> to vector<8xf32>
    %125 = vector.shape_cast %124 : vector<8xf32> to vector<8x1xf32>
    %cst_54 = arith.constant 1.000000e-30 : f32
    %126 = vector.broadcast %cst_54 : f32 to vector<8x1xf32>
    %127 = arith.maximumf %125, %126 : vector<8x1xf32>
    %128 = vector.broadcast %127 : vector<8x1xf32> to vector<8x8xf32>
    %129 = arith.divf %123, %128 : vector<8x8xf32>
    %cst_55 = arith.constant dense<0.000000e+00> : vector<8x64xf32>
    %130 = tpu.matmul %129, %1, %cst_55 {dimension_numbers = #tpu.dot_dimension_numbers<[1], [0], [0], [1], [0, 0, 1, 1], [], []>} : vector<8x8xf32>, vector<8x64xf32>, vector<8x64xf32> -> vector<8x64xf32>
    %c2_56 = arith.constant 2 : index
    %c0_57 = arith.constant 0 : index
    %c0_58 = arith.constant 0 : index
    %131 = vector.load %arg4[%c2_56, %c0_57, %c0_58] : memref<4x8x64xf32, #tpu.memory_space<vmem>>, vector<1x8x64xf32>
    %132 = vector.shape_cast %131 : vector<1x8x64xf32> to vector<8x64xf32>
    %cst_59 = arith.constant dense<0.000000e+00> : vector<8x8xf32>
    %133 = tpu.matmul %130, %2, %cst_59 {dimension_numbers = #tpu.dot_dimension_numbers<[1], [0], [0], [1], [0, 0, 1, 1], [], []>} : vector<8x64xf32>, vector<64x8xf32>, vector<8x8xf32> -> vector<8x8xf32>
    %134 = vector.broadcast %3 : vector<1x8xf32> to vector<8x8xf32>
    %135 = arith.addf %133, %134 : vector<8x8xf32>
    %136 = arith.mulf %132, %130 : vector<8x64xf32>
    %cst_60 = arith.constant dense<0.000000e+00> : vector<8xf32>
    %137 = vector.multi_reduction <add>, %136, %cst_60 [1] : vector<8x64xf32> to vector<8xf32>
    %138 = vector.shape_cast %137 : vector<8xf32> to vector<8x1xf32>
    %139 = vector.broadcast %138 : vector<8x1xf32> to vector<8x8xf32>
    %140 = arith.addf %135, %139 : vector<8x8xf32>
    %cst_61 = arith.constant dense<0xFF800000> : vector<8xf32>
    %141 = vector.multi_reduction <maximumf>, %140, %cst_61 [1] : vector<8x8xf32> to vector<8xf32>
    %142 = vector.shape_cast %141 : vector<8xf32> to vector<8x1xf32>
    %143 = vector.broadcast %142 : vector<8x1xf32> to vector<8x8xf32>
    %144 = arith.subf %140, %143 : vector<8x8xf32>
    %145 = math.exp %144 : vector<8x8xf32>
    %cst_62 = arith.constant dense<0.000000e+00> : vector<8xf32>
    %146 = vector.multi_reduction <add>, %145, %cst_62 [1] : vector<8x8xf32> to vector<8xf32>
    %147 = vector.shape_cast %146 : vector<8xf32> to vector<8x1xf32>
    %148 = math.log %147 : vector<8x1xf32>
    %149 = arith.addf %142, %148 : vector<8x1xf32>
    %150 = vector.broadcast %149 : vector<8x1xf32> to vector<8x8xf32>
    %151 = arith.subf %140, %150 : vector<8x8xf32>
    %c2_63 = arith.constant 2 : index
    %c0_64 = arith.constant 0 : index
    %c0_65 = arith.constant 0 : index
    %152 = vector.load %arg7[%c2_63, %c0_64, %c0_65] : memref<4x8x8xf32, #tpu.memory_space<vmem>>, vector<1x8x8xf32>
    %153 = vector.shape_cast %152 : vector<1x8x8xf32> to vector<8x8xf32>
    %154 = arith.mulf %151, %153 : vector<8x8xf32>
    %cst_66 = arith.constant dense<0.000000e+00> : vector<8xf32>
    %155 = vector.multi_reduction <add>, %154, %cst_66 [1] : vector<8x8xf32> to vector<8xf32>
    %156 = vector.shape_cast %155 : vector<8xf32> to vector<8x1xf32>
    %c0_67 = arith.constant 0 : index
    %c2_68 = arith.constant 2 : index
    %157 = vector.load %arg8[%c0_67, %c2_68] : memref<8x4xf32, #tpu.memory_space<vmem>>, vector<8x1xf32>
    tpu.vector_store %arg8[%c0_67, %c2_68], %156 {strides = array<i32>} : memref<8x4xf32, #tpu.memory_space<vmem>>, vector<8x1xf32>,
    %c3 = arith.constant 3 : index
    %c0_69 = arith.constant 0 : index
    %158 = vector.load %arg3[%c3, %c0_69] : memref<4x8xf32, #tpu.memory_space<vmem>>, vector<1x8xf32>
    %159 = vector.broadcast %158 : vector<1x8xf32> to vector<8x8xf32>
    %160 = arith.mulf %7, %159 : vector<8x8xf32>
    %cst_70 = arith.constant 1.000000e+00 : f32
    %161 = vector.broadcast %cst_70 : f32 to vector<1x8xf32>
    %162 = arith.subf %161, %158 : vector<1x8xf32>
    %cst_71 = arith.constant 1.000000e+30 : f32
    %163 = vector.broadcast %cst_71 : f32 to vector<1x8xf32>
    %164 = arith.mulf %163, %162 : vector<1x8xf32>
    %165 = vector.broadcast %164 : vector<1x8xf32> to vector<8x8xf32>
    %166 = arith.subf %160, %165 : vector<8x8xf32>
    %cst_72 = arith.constant dense<0xFF800000> : vector<8xf32>
    %167 = vector.multi_reduction <maximumf>, %166, %cst_72 [1] : vector<8x8xf32> to vector<8xf32>
    %168 = vector.shape_cast %167 : vector<8xf32> to vector<8x1xf32>
    %169 = vector.broadcast %168 : vector<8x1xf32> to vector<8x8xf32>
    %170 = arith.subf %166, %169 : vector<8x8xf32>
    %171 = math.exp %170 : vector<8x8xf32>
    %172 = vector.broadcast %158 : vector<1x8xf32> to vector<8x8xf32>
    %173 = arith.mulf %171, %172 : vector<8x8xf32>
    %cst_73 = arith.constant dense<0.000000e+00> : vector<8xf32>
    %174 = vector.multi_reduction <add>, %173, %cst_73 [1] : vector<8x8xf32> to vector<8xf32>
    %175 = vector.shape_cast %174 : vector<8xf32> to vector<8x1xf32>
    %cst_74 = arith.constant 1.000000e-30 : f32
    %176 = vector.broadcast %cst_74 : f32 to vector<8x1xf32>
    %177 = arith.maximumf %175, %176 : vector<8x1xf32>
    %178 = vector.broadcast %177 : vector<8x1xf32> to vector<8x8xf32>
    %179 = arith.divf %173, %178 : vector<8x8xf32>
    %cst_75 = arith.constant dense<0.000000e+00> : vector<8x64xf32>
    %180 = tpu.matmul %179, %1, %cst_75 {dimension_numbers = #tpu.dot_dimension_numbers<[1], [0], [0], [1], [0, 0, 1, 1], [], []>} : vector<8x8xf32>, vector<8x64xf32>, vector<8x64xf32> -> vector<8x64xf32>
    %c3_76 = arith.constant 3 : index
    %c0_77 = arith.constant 0 : index
    %c0_78 = arith.constant 0 : index
    %181 = vector.load %arg4[%c3_76, %c0_77, %c0_78] : memref<4x8x64xf32, #tpu.memory_space<vmem>>, vector<1x8x64xf32>
    %182 = vector.shape_cast %181 : vector<1x8x64xf32> to vector<8x64xf32>
    %cst_79 = arith.constant dense<0.000000e+00> : vector<8x8xf32>
    %183 = tpu.matmul %180, %2, %cst_79 {dimension_numbers = #tpu.dot_dimension_numbers<[1], [0], [0], [1], [0, 0, 1, 1], [], []>} : vector<8x64xf32>, vector<64x8xf32>, vector<8x8xf32> -> vector<8x8xf32>
    %184 = vector.broadcast %3 : vector<1x8xf32> to vector<8x8xf32>
    %185 = arith.addf %183, %184 : vector<8x8xf32>
    %186 = arith.mulf %182, %180 : vector<8x64xf32>
    %cst_80 = arith.constant dense<0.000000e+00> : vector<8xf32>
    %187 = vector.multi_reduction <add>, %186, %cst_80 [1] : vector<8x64xf32> to vector<8xf32>
    %188 = vector.shape_cast %187 : vector<8xf32> to vector<8x1xf32>
    %189 = vector.broadcast %188 : vector<8x1xf32> to vector<8x8xf32>
    %190 = arith.addf %185, %189 : vector<8x8xf32>
    %cst_81 = arith.constant dense<0xFF800000> : vector<8xf32>
    %191 = vector.multi_reduction <maximumf>, %190, %cst_81 [1] : vector<8x8xf32> to vector<8xf32>
    %192 = vector.shape_cast %191 : vector<8xf32> to vector<8x1xf32>
    %193 = vector.broadcast %192 : vector<8x1xf32> to vector<8x8xf32>
    %194 = arith.subf %190, %193 : vector<8x8xf32>
    %195 = math.exp %194 : vector<8x8xf32>
    %cst_82 = arith.constant dense<0.000000e+00> : vector<8xf32>
    %196 = vector.multi_reduction <add>, %195, %cst_82 [1] : vector<8x8xf32> to vector<8xf32>
    %197 = vector.shape_cast %196 : vector<8xf32> to vector<8x1xf32>
    %198 = math.log %197 : vector<8x1xf32>
    %199 = arith.addf %192, %198 : vector<8x1xf32>
    %200 = vector.broadcast %199 : vector<8x1xf32> to vector<8x8xf32>
    %201 = arith.subf %190, %200 : vector<8x8xf32>
    %c3_83 = arith.constant 3 : index
    %c0_84 = arith.constant 0 : index
    %c0_85 = arith.constant 0 : index
    %202 = vector.load %arg7[%c3_83, %c0_84, %c0_85] : memref<4x8x8xf32, #tpu.memory_space<vmem>>, vector<1x8x8xf32>
    %203 = vector.shape_cast %202 : vector<1x8x8xf32> to vector<8x8xf32>
    %204 = arith.mulf %201, %203 : vector<8x8xf32>
    %cst_86 = arith.constant dense<0.000000e+00> : vector<8xf32>
    %205 = vector.multi_reduction <add>, %204, %cst_86 [1] : vector<8x8xf32> to vector<8xf32>
    %206 = vector.shape_cast %205 : vector<8xf32> to vector<8x1xf32>
    %c0_87 = arith.constant 0 : index
    %c3_88 = arith.constant 3 : index
    %207 = vector.load %arg8[%c0_87, %c3_88] : memref<8x4xf32, #tpu.memory_space<vmem>>, vector<8x1xf32>
    tpu.vector_store %arg8[%c0_87, %c3_88], %206 {strides = array<i32>} : memref<8x4xf32, #tpu.memory_space<vmem>>, vector<8x1xf32>,
    return
  }
  func.func @transform_0(%arg0: i32) -> (i32, i32, i32) {
    %c0_i32 = arith.constant 0 : i32
    %c0_i32_0 = arith.constant 0 : i32
    %c0_i32_1 = arith.constant 0 : i32
    %c0_i32_2 = arith.constant 0 : i32
    return %c0_i32, %c0_i32_0, %c0_i32_1 : i32, i32, i32
  }
  func.func @transform_1(%arg0: i32) -> (i32, i32) {
    %c0_i32 = arith.constant 0 : i32
    %c0_i32_0 = arith.constant 0 : i32
    %c0_i32_1 = arith.constant 0 : i32
    return %c0_i32, %c0_i32_0 : i32, i32
  }
  func.func @transform_2(%arg0: i32) -> (i32, i32) {
    %c0_i32 = arith.constant 0 : i32
    %c0_i32_0 = arith.constant 0 : i32
    %c0_i32_1 = arith.constant 0 : i32
    return %c0_i32, %c0_i32_0 : i32, i32
  }
  func.func @transform_3(%arg0: i32) -> (i32, i32, i32) {
    %c0_i32 = arith.constant 0 : i32
    %c0_i32_0 = arith.constant 0 : i32
    %c0_i32_1 = arith.constant 0 : i32
    %c0_i32_2 = arith.constant 0 : i32
    return %c0_i32, %c0_i32_0, %c0_i32_1 : i32, i32, i32
  }
  func.func @transform_4(%arg0: i32) -> (i32, i32) {
    %c0_i32 = arith.constant 0 : i32
    %c0_i32_0 = arith.constant 0 : i32
    %c0_i32_1 = arith.constant 0 : i32
    return %c0_i32, %c0_i32_0 : i32, i32
  }
  func.func @transform_5(%arg0: i32) -> (i32, i32) {
    %c0_i32 = arith.constant 0 : i32
    %c0_i32_0 = arith.constant 0 : i32
    %c0_i32_1 = arith.constant 0 : i32
    return %c0_i32, %c0_i32_0 : i32, i32
  }
  func.func @transform_6(%arg0: i32) -> (i32, i32, i32) {
    %c0_i32 = arith.constant 0 : i32
    %c0_i32_0 = arith.constant 0 : i32
    %c0_i32_1 = arith.constant 0 : i32
    %c0_i32_2 = arith.constant 0 : i32
    return %c0_i32, %c0_i32_0, %c0_i32_1 : i32, i32, i32
  }
  func.func @transform_7(%arg0: i32) -> (i32, i32) {
    %c0_i32 = arith.constant 0 : i32
    %c0_i32_0 = arith.constant 0 : i32
    %c0_i32_1 = arith.constant 0 : i32
    return %c0_i32, %c0_i32_0 : i32, i32
  }
}

</mosaic_0001>

<bundles_post_ra>
// kernel: tpu_custom_call.1
= control target key start
LH: loop header
LB: loop body
LE: loop exit
PB: predicated region body
PF: predicated region fallthrough
CT: control target
= control target key end

     0   :  { %12 = vsyncpa [#allocation3], 0  ;;  %s3438_s0 = inlined_call_operand.vmem [shape: f32[8,8,64], index: 0, kind: input, shape index: {}]   ;;  %s3439_s1 = inlined_call_operand.vmem [shape: f32[8,64], index: 1, kind: input, shape index: {}]   ;;  %s3440_s2 = inlined_call_operand.hbm [shape: f32[4,8], index: 2, kind: input, shape index: {}]   ;;  %s3441_s3 = inlined_call_operand.hbm [shape: f32[4,8,64], index: 3, kind: input, shape index: {}]   ;;  %s3442_s4 = inlined_call_operand.vmem [shape: f32[64,8], index: 4, kind: input, shape index: {}]   ;;  %s3443_s5 = inlined_call_operand.vmem [shape: f32[1,8], index: 5, kind: input, shape index: {}]   ;;  %s3444_s6 = inlined_call_operand.hbm [shape: f32[4,8,8], index: 6, kind: input, shape index: {}]   ;;  %s3445_s7 = inlined_call_operand.vmem [shape: f32[8,4], index: 7, kind: output, shape index: {}]  }
   0x1   :  { %13 = vsyncpa [#allocation5], 0  ;;  %s33_s26 = sshll.u32 %s3441_s3, 4  ;;  %s2169_s27 = smov [#allocation4]   ;;  %s34_s26 = int_to_ptr.hbm [resolvable:$true] %s33_s26 }
   0x2   :  { %s35_s28 = sshll.u32 %s2169_s27, 4  ;;  %s23_s8 = sshll.u32 %s3440_s2, 4  ;;  %s36_s28 = int_to_ptr.vmem [resolvable:$true] %s35_s28  ;;  %s24_s8 = int_to_ptr.hbm [resolvable:$true] %s23_s8 }
   0x3   :  { %s2170_s9 = smov 128   ;;  %s2171_s10 = smov 8  }
   0x4   :  { %41 = dma.hbm_to_vmem [thread:$0]  %s34_s26, 512, %s36_s28, [#allocation5], %s2170_s9, %s2170_s9, %s2171_s10  }
   0x5   :  { %s2172_s11 = smov [#allocation2]   ;;  %s50_s15 = sshll.u32 %s3444_s6, 4  ;;  %s51_s15 = int_to_ptr.hbm [resolvable:$true] %s50_s15 }
   0x6   :  { %s25_s12 = sshll.u32 %s2172_s11, 4  ;;  %s2173_s3 = smov [#allocation6]   ;;  %s26_s12 = int_to_ptr.vmem [resolvable:$true] %s25_s12 }
   0x7   :  { %28 = dma.hbm_to_vmem [thread:$0]  %s24_s8, 64, %s26_s12, [#allocation3]  }
   0x8   :  { %s52_s16 = sshll.u32 %s2173_s3, 4  ;;  %s53_s16 = int_to_ptr.vmem [resolvable:$true] %s52_s16 }
   0x9   :  { %58 = dma.hbm_to_vmem [thread:$0]  %s51_s15, 512, %s53_s16, [#allocation5], %s2170_s9, %s2170_s9, %s2171_s10  }
   0xa   :  { %2165 = dma.done.wait [#allocation3], 64  }
   0xb   :  { %2166 = vsyncadd [#allocation3], 4294967232 }
   0xc   :  { %2167 = dma.done.wait [#allocation5], 1024  }
   0xd   :  { %2168 = vsyncadd [#allocation5], 4294966272  ;;  %v125_v0 = vlaneseq  ;;  %v75_v2 = vld [vmem:[%s3438_s0 + $0x20] sm:$0xff]  ;;  %vm3446_vm0 = vcmask 523264   ;;  %v73_v4 = vld [vmem:[%s3438_s0 + $0x10] sm:$0xff]  ;;  %v2174_v47 = vmov 0  }
   0xe   :  { %v79_v3 = vld [vmem:[%s3439_s1] sm:$0xff]  ;;  %v76_v9 = vld [vmem:[%s3438_s0 + $0x28] sm:$0xff]  ;;  %v74_v10 = vld [vmem:[%s3438_s0 + $0x18] sm:$0xff]  ;;  %vm201_vm1 = vcmask 1041409   ;;  %vm3461_vm2 = vcmask 1042434   ;;  %vm3457_vm3 = vcmask 1043459  }
   0xf   :  { %v126_v1 = vshrl.u32 %v125_v0, 7  ;;  %v93_v5 = vmul.f32 %v79_v3, %v75_v2  ;;  %v91_v6 = vmul.f32 %v79_v3, %v73_v4  ;;  %v71_v7 = vld [vmem:[%s3438_s0] sm:$0xff]  ;;  %522 = vmatpush.msra.mxu0 %v79_v3  ;;  %969 = vmatpush.msra.mxu2 %v79_v3  ;;  %v72_v13 = vld [vmem:[%s3438_s0 + $0x8] sm:$0xff]  ;;  %v94_v15 = vmul.f32 %v79_v3, %v76_v9  ;;  %v78_v21 = vld [vmem:[%s3438_s0 + $0x38] sm:$0xff] }
  0x10   :  { %v89_v8 = vmul.f32 %v79_v3, %v71_v7  ;;  %v92_v16 = vmul.f32 %v79_v3, %v74_v10  ;;  %v90_v17 = vmul.f32 %v79_v3, %v72_v13  ;;  %v77_v22 = vld [vmem:[%s3438_s0 + $0x30] sm:$0xff]  ;;  %v96_v23 = vmul.f32 %v79_v3, %v78_v21  ;;  %v122_v27 = vld [vmem:[#allocation2] sm:$0x1]  ;;  %v579_v29 = vld [vmem:[#allocation2 + $0x1] sm:$0x1] }
  0x11   :  { %1938 = vset.pattern.permute.xlu0 %v126_v1  ;;  %1939 = vset.pattern.permute.xlu1 %v126_v1  ;;  %v110_v11 = vsel %vm3446_vm0, %v93_v5, 0.0  ;;  %v104_v12 = vsel %vm3446_vm0, %v91_v6, 0.0  ;;  %v113_v18 = vsel %vm3446_vm0, %v94_v15, 0.0  ;;  %v95_v24 = vmul.f32 %v79_v3, %v77_v22  ;;  %v1943_v30 = vld [vmem:[#allocation2] ss:$0 sm:$0xff] }
  0x12   :  { %1937 = vset.pattern.permute.xlu2 %v126_v1  ;;  %1415 = vmatpush.msrb.mxu0 %v79_v3  ;;  %v98_v14 = vsel %vm3446_vm0, %v89_v8, 0.0  ;;  %v107_v19 = vsel %vm3446_vm0, %v92_v16, 0.0  ;;  %v101_v20 = vsel %vm3446_vm0, %v90_v17, 0.0  ;;  %v119_v25 = vsel %vm3446_vm0, %v96_v23, 0.0  ;;  %v1025_v35 = vld [vmem:[#allocation2 + $0x2] sm:$0x1] }
  0x13   :  { %111 = vadd.xlane.f32.xlu2 %v110_v11  ;;  %105 = vadd.xlane.f32.xlu1 %v104_v12  ;;  %v116_v26 = vsel %vm3446_vm0, %v95_v24, 0.0  ;;  %v140_v28 = vsub.f32 1.0, %v122_v27  ;;  %v597_v31 = vsub.f32 1.0, %v579_v29  ;;  %v1944_v37 = vld [vmem:[#allocation2 + $0x2] ss:$0 sm:$0xff]  ;;  %v1043_v38 = vsub.f32 1.0, %v1025_v35 }
  0x14   :  { %99 = vadd.xlane.f32.xlu0 %v98_v14  ;;  %v1945_v39 = vld [vmem:[#allocation2 + $0x1] ss:$0 sm:$0xff]  ;;  %v1471_v41 = vld [vmem:[#allocation2 + $0x3] sm:$0x1]  ;;  %vm3456_vm4 = vcmask 1044484   ;;  %vm3455_vm5 = vcmask 1045509  }
  0x15   :  { %v141_v32 = vmul.f32 1e+30, %v140_v28  ;;  %v598_v33 = vmul.f32 1e+30, %v597_v31  ;;  %v1044_v40 = vmul.f32 1e+30, %v1043_v38 }
  0x16   :  { %v1489_v43 = vsub.f32 1.0, %v1471_v41  ;;  %v1946_v44 = vld [vmem:[#allocation2 + $0x3] ss:$0 sm:$0xff]  ;;  %vm3449_vm6 = vcmask 1046534   ;;  %vm3448_vm7 = vcmask 1047559   ;;  %vm3447_vm8 = vcmask 64512  }
  0x17   :  { %v142_v34 = vperm.slane %v141_v32, 0  ;;  %v599_v36 = vperm.slane %v598_v33, 0  ;;  %v1045_v42 = vperm.slane %v1044_v40, 0 }
  0x18   :  { %v1490_v45 = vmul.f32 1e+30, %v1489_v43 }
  0x1a   :  { %v1491_v46 = vperm.slane %v1490_v45, 0 }
  0x1b   :  { %114 = vadd.xlane.f32.xlu2 %v113_v18  ;;  %108 = vadd.xlane.f32.xlu1 %v107_v19 }
  0x1c   :  { %102 = vadd.xlane.f32.xlu0 %v101_v20 }
  0x23   :  { %120 = vadd.xlane.f32.xlu1 %v119_v25 }
  0x24   :  { %117 = vadd.xlane.f32.xlu0 %v116_v26 }
  0x33   :  { %129 = vperm.xlu2 %1937, %v1943_v30  }
  0x38   :  { %148 = vperm.xlu0 %1938, %v142_v34  }
  0x3b   :  { %605 = vperm.xlu2 %1937, %v599_v36  }
  0x3c   :  { %1032 = vperm.xlu1 %1939, %v1944_v37  }
  0x40   :  { %586 = vperm.xlu0 %1938, %v1945_v39  }
  0x43   :  { %1941 = vset.pattern.permute.xlu2 %v2174_v47 }
  0x44   :  { %1051 = vperm.xlu1 %1939, %v1045_v42  }
  0x48   :  { %1478 = vperm.xlu0 %1938, %v1946_v44  }
  0x4c   :  { %1497 = vperm.xlu1 %1939, %v1491_v46  }
  0x50   :  { %1942 = vset.pattern.permute.xlu0 %v2174_v47 }
  0x54   :  { %1940 = vset.pattern.permute.xlu1 %v2174_v47 }
  0x86   :  { %v2262_v49 = vpop.xlane.xlu2 %111  ;;  %v2266_v51 = vpop.xlane.xlu1 %105 }
  0x87   :  { %v2260_v48 = vpop.xlane.xlu0 %99 }
  0x8e   :  { %v2268_v52 = vpop.xlane.xlu2 %114  ;;  %v2272_v54 = vpop.xlane.xlu1 %108 }
  0x8f   :  { %v2264_v50 = vpop.xlane.xlu0 %102 }
  0x96   :  { %v2274_v55 = vpop.permute.xlu2 %129  ;;  %v2290_v63 = vpop.xlane.xlu1 %120 }
  0x97   :  { %v2270_v53 = vpop.xlane.xlu0 %117  ;;  %v133_v57 = vmul.f32 %v2274_v55, %v2264_v50  ;;  %v132_v58 = vmul.f32 %v2274_v55, %v2260_v48  ;;  %v134_v1 = vmul.f32 %v2274_v55, %v2266_v51  ;;  %v135_v2 = vmul.f32 %v2274_v55, %v2272_v54 }
  0x98   :  { %v138_v56 = vmul.f32 %v2274_v55, %v2270_v53  ;;  %v136_v10 = vmul.f32 %v2274_v55, %v2262_v49  ;;  %v137_v12 = vmul.f32 %v2274_v55, %v2268_v52  ;;  %v139_v16 = vmul.f32 %v2274_v55, %v2290_v63 }
  0x9e   :  { %v606_v6 = vpop.permute.xlu2 %605 }
  0xaa   :  { %v149_v59 = vpop.permute.xlu0 %148 }
  0xab   :  { %v2282_v60 = vsub.f32 %v138_v56, %v149_v59  ;;  %v2284_v61 = vsub.f32 %v133_v57, %v149_v59  ;;  %v2286_v62 = vsub.f32 %v132_v58, %v149_v59  ;;  %v2299_v4 = vsub.f32 %v134_v1, %v149_v59 }
  0xac   :  { %v2303_v7 = vsub.f32 %v135_v2, %v149_v59  ;;  %v2318_v13 = vsub.f32 %v136_v10, %v149_v59  ;;  %v2320_v14 = vsub.f32 %v137_v12, %v149_v59  ;;  %v2331_v19 = vsub.f32 %v139_v16, %v149_v59 }
  0xad   :  { %186 = vperm.xlu0 %1942, %v2282_v60   ;;  %171 = vperm.xlu2 %1941, %v2284_v61  }
  0xae   :  { %168 = vperm.xlu1 %1940, %v2286_v62   ;;  %v2310_v9 = vpop.permute.xlu1 %1032 }
  0xaf   :  { %v1037_v20 = vmul.f32 %v2310_v9, %v2266_v51  ;;  %v1040_v26 = vmul.f32 %v2310_v9, %v2268_v52  ;;  %v1036_v38 = vmul.f32 %v2310_v9, %v2264_v50  ;;  %v1035_v43 = vmul.f32 %v2310_v9, %v2260_v48 }
  0xb0   :  { %v1039_v44 = vmul.f32 %v2310_v9, %v2262_v49  ;;  %v1038_v57 = vmul.f32 %v2310_v9, %v2272_v54  ;;  %v1041_v1 = vmul.f32 %v2310_v9, %v2270_v53 }
  0xb2   :  { %v2297_v3 = vpop.permute.xlu0 %586 }
  0xb3   :  { %v593_v5 = vmul.f32 %v2297_v3, %v2262_v49  ;;  %v596_v11 = vmul.f32 %v2297_v3, %v2290_v63  ;;  %v590_v17 = vmul.f32 %v2297_v3, %v2264_v50  ;;  %v589_v23 = vmul.f32 %v2297_v3, %v2260_v48 }
  0xb4   :  { %v592_v24 = vmul.f32 %v2297_v3, %v2272_v54  ;;  %v591_v29 = vmul.f32 %v2297_v3, %v2266_v51  ;;  %v595_v31 = vmul.f32 %v2297_v3, %v2270_v53  ;;  %v594_v37 = vmul.f32 %v2297_v3, %v2268_v52 }
  0xb5   :  { %174 = vperm.xlu2 %1941, %v2299_v4   ;;  %v2306_v8 = vsub.f32 %v593_v5, %v606_v6  ;;  %v2323_v15 = vsub.f32 %v596_v11, %v606_v6  ;;  %v2335_v21 = vsub.f32 %v590_v17, %v606_v6  ;;  %v2346_v25 = vsub.f32 %v589_v23, %v606_v6 }
  0xb6   :  { %177 = vperm.xlu1 %1940, %v2303_v7   ;;  %v1052_v18 = vpop.permute.xlu1 %1051  ;;  %v2350_v27 = vsub.f32 %v592_v24, %v606_v6  ;;  %v2363_v33 = vsub.f32 %v591_v29, %v606_v6  ;;  %v2367_v35 = vsub.f32 %v595_v31, %v606_v6  ;;  %v2378_v39 = vsub.f32 %v594_v37, %v606_v6 }
  0xb7   :  { %637 = vperm.xlu0 %1942, %v2306_v8   ;;  %v2338_v22 = vsub.f32 %v1037_v20, %v1052_v18  ;;  %v2353_v28 = vsub.f32 %v1040_v26, %v1052_v18  ;;  %v2382_v41 = vsub.f32 %v1036_v38, %v1052_v18  ;;  %v2393_v45 = vsub.f32 %v1035_v43, %v1052_v18 }
  0xb8   :  { %v2397_v47 = vsub.f32 %v1039_v44, %v1052_v18  ;;  %v2408_v58 = vsub.f32 %v1038_v57, %v1052_v18  ;;  %v2418_v5 = vsub.f32 %v1041_v1, %v1052_v18  ;;  %v2445_v24 = vand.u32 127, %v125_v0 }
  0xba   :  { %v2359_v30 = vpop.permute.xlu0 %1478  ;;  %3462 = vst [vmem:[#allocation9_spill] sm:$0xff] %v2445_v24 }
  0xbb   :  { %v1481_v34 = vmul.f32 %v2359_v30, %v2260_v48  ;;  %v1484_v40 = vmul.f32 %v2359_v30, %v2272_v54  ;;  %v1487_v46 = vmul.f32 %v2359_v30, %v2270_v53  ;;  %v1042_v48 = vmul.f32 %v2310_v9, %v2290_v63 }
  0xbc   :  { %v1483_v2 = vmul.f32 %v2359_v30, %v2266_v51  ;;  %v1482_v54 = vmul.f32 %v2359_v30, %v2264_v50  ;;  %v1486_v10 = vmul.f32 %v2359_v30, %v2268_v52  ;;  %v1485_v51 = vmul.f32 %v2359_v30, %v2262_v49 }
  0xbd   :  { %180 = vperm.xlu2 %1941, %v2318_v13   ;;  %v2410_v59 = vsub.f32 %v1042_v48, %v1052_v18  ;;  %v1488_v50 = vmul.f32 %v2359_v30, %v2290_v63 }
  0xbe   :  { %183 = vperm.xlu1 %1940, %v2320_v14   ;;  %v1498_v32 = vpop.permute.xlu1 %1497 }
  0xbf   :  { %646 = vperm.xlu0 %1942, %v2323_v15   ;;  %v2370_v36 = vsub.f32 %v1481_v34, %v1498_v32  ;;  %v2385_v42 = vsub.f32 %v1484_v40, %v1498_v32  ;;  %v2400_v56 = vsub.f32 %v1487_v46, %v1498_v32  ;;  %v2420_v6 = vsub.f32 %v1483_v2, %v1498_v32 }
  0xc0   :  { %v2428_v11 = vsub.f32 %v1482_v54, %v1498_v32  ;;  %v2430_v53 = vsub.f32 %v1486_v10, %v1498_v32  ;;  %v2436_v12 = vsub.f32 %v1485_v51, %v1498_v32  ;;  %v2441_v52 = vsub.f32 %v1488_v50, %v1498_v32 }
  0xc5   :  { %189 = vperm.xlu2 %1941, %v2331_v19  }
  0xc6   :  { %628 = vperm.xlu1 %1940, %v2335_v21  }
  0xc7   :  { %1077 = vperm.xlu0 %1942, %v2338_v22  }
  0xcd   :  { %625 = vperm.xlu2 %1941, %v2346_v25  }
  0xce   :  { %634 = vperm.xlu1 %1940, %v2350_v27  }
  0xcf   :  { %1086 = vperm.xlu0 %1942, %v2353_v28  }
  0xd5   :  { %631 = vperm.xlu2 %1941, %v2363_v33  }
  0xd6   :  { %643 = vperm.xlu1 %1940, %v2367_v35  }
  0xd7   :  { %1517 = vperm.xlu0 %1942, %v2370_v36  }
  0xdd   :  { %640 = vperm.xlu2 %1941, %v2378_v39  }
  0xde   :  { %1074 = vperm.xlu1 %1940, %v2382_v41  }
  0xdf   :  { %1526 = vperm.xlu0 %1942, %v2385_v42  }
  0xe5   :  { %1071 = vperm.xlu2 %1941, %v2393_v45  }
  0xe6   :  { %1083 = vperm.xlu1 %1940, %v2397_v47  }
  0xe7   :  { %1535 = vperm.xlu0 %1942, %v2400_v56  }
  0xed   :  { %1080 = vperm.xlu2 %1941, %v2408_v58  }
  0xee   :  { %1092 = vperm.xlu1 %1940, %v2410_v59  }
  0xf5   :  { %1089 = vperm.xlu2 %1941, %v2418_v5  }
  0xf6   :  { %1523 = vperm.xlu1 %1940, %v2420_v6  }
  0xfd   :  { %1520 = vperm.xlu2 %1941, %v2428_v11  }
  0xfe   :  { %1532 = vperm.xlu1 %1940, %v2430_v53  }
 0x105   :  { %1529 = vperm.xlu2 %1941, %v2436_v12  }
 0x107   :  { %v172_v16 = vpop.permute.xlu2 %171 }
 0x108   :  { %v194_v31 = vperm.slane %v172_v16, %v2445_v24 }
 0x10d   :  { %1538 = vperm.xlu2 %1941, %v2441_v52  }
 0x10f   :  { %v175_v17 = vpop.permute.xlu2 %174 }
 0x110   :  { %v195_v37 = vperm.slane %v175_v17, %v2445_v24 }
 0x117   :  { %v181_v18 = vpop.permute.xlu2 %180 }
 0x118   :  { %v197_v43 = vperm.slane %v181_v18, %v2445_v24 }
 0x11f   :  { %v190_v20 = vpop.permute.xlu2 %189  ;;  %v187_v32 = vpop.permute.xlu0 %186 }
 0x120   :  { %v169_v23 = vpop.permute.xlu1 %168  ;;  %v199_v48 = vperm.slane %v187_v32, %v2445_v24  ;;  %v200_v1 = vperm.slane %v190_v20, %v2445_v24 }
 0x121   :  { %v193_v49 = vperm.slane %v169_v23, %v2445_v24 }
 0x123   :  { %v202_v63 = vsel %vm201_vm1, %v194_v31, %v193_v49 }
 0x124   :  { %v204_v38 = vsel %vm3461_vm2, %v195_v37, %v202_v63 }
 0x127   :  { %v626_v26 = vpop.permute.xlu2 %625 }
 0x128   :  { %v178_v29 = vpop.permute.xlu1 %177  ;;  %v648_v49 = vperm.slane %v626_v26, %v2445_v24 }
 0x129   :  { %v196_v34 = vperm.slane %v178_v29, %v2445_v24  ;;  %v638_v2 = vpop.permute.xlu0 %637 }
 0x12b   :  { %v206_v0 = vsel %vm3457_vm3, %v196_v34, %v204_v38  ;;  %v652_v38 = vperm.slane %v638_v2, %v2445_v24 }
 0x12c   :  { %v208_v57 = vsel %vm3456_vm4, %v197_v43, %v206_v0 }
 0x12f   :  { %v632_v40 = vpop.permute.xlu2 %631 }
 0x130   :  { %v184_v44 = vpop.permute.xlu1 %183  ;;  %v650_v63 = vperm.slane %v632_v40, %v2445_v24 }
 0x131   :  { %v198_v46 = vperm.slane %v184_v44, %v2445_v24  ;;  %v647_v23 = vpop.permute.xlu0 %646 }
 0x133   :  { %v210_v54 = vsel %vm3455_vm5, %v198_v46, %v208_v57  ;;  %v655_v57 = vperm.slane %v647_v23, %v2445_v24 }
 0x134   :  { %v212_v10 = vsel %vm3449_vm6, %v199_v48, %v210_v54 }
 0x135   :  { %v214_v51 = vsel %vm3448_vm7, %v200_v1, %v212_v10 }
 0x136   :  { %v217_v16 = vsel %vm3447_vm8, %v214_v51, -inf }
 0x137   :  { %218 = vmax.xlane.f32.xlu1 %v217_v16  ;;  %v641_v50 = vpop.permute.xlu2 %640 }
 0x138   :  { %v629_v17 = vpop.permute.xlu1 %628  ;;  %v653_v44 = vperm.slane %v641_v50, %v2445_v24 }
 0x139   :  { %v649_v18 = vperm.slane %v629_v17, %v2445_v24  ;;  %v1078_v0 = vpop.permute.xlu0 %1077 }
 0x13a   :  { %v1096_v23 = vperm.slane %v1078_v0, %v2445_v24 }
 0x13b   :  { %v656_v20 = vsel %vm201_vm1, %v649_v18, %v648_v49 }
 0x13c   :  { %v657_v34 = vsel %vm3461_vm2, %v650_v63, %v656_v20 }
 0x13f   :  { %v1072_v29 = vpop.permute.xlu2 %1071 }
 0x140   :  { %v635_v31 = vpop.permute.xlu1 %634  ;;  %v1094_v17 = vperm.slane %v1072_v29, %v2445_v24 }
 0x141   :  { %v651_v32 = vperm.slane %v635_v31, %v2445_v24  ;;  %v1087_v51 = vpop.permute.xlu0 %1086 }
 0x143   :  { %v658_v37 = vsel %vm3457_vm3, %v651_v32, %v657_v34 }
 0x144   :  { %v659_v43 = vsel %vm3456_vm4, %v652_v38, %v658_v37 }
 0x145   :  { %v660_v40 = vsel %vm3455_vm5, %v653_v44, %v659_v43  ;;  %v1099_v43 = vperm.slane %v1087_v51, %v2445_v24 }
 0x147   :  { %v1081_v46 = vpop.permute.xlu2 %1080 }
 0x148   :  { %v644_v26 = vpop.permute.xlu1 %643  ;;  %v1097_v31 = vperm.slane %v1081_v46, %v2445_v24 }
 0x149   :  { %v654_v48 = vperm.slane %v644_v26, %v2445_v24  ;;  %v1518_v32 = vpop.permute.xlu0 %1517 }
 0x14b   :  { %v661_v1 = vsel %vm3449_vm6, %v654_v48, %v660_v40 }
 0x14c   :  { %v662_v54 = vsel %vm3448_vm7, %v655_v57, %v661_v1 }
 0x14d   :  { %v664_v10 = vsel %vm3447_vm8, %v662_v54, -inf }
 0x14e   :  { %665 = vmax.xlane.f32.xlu1 %v664_v10 }
 0x14f   :  { %v1090_v50 = vpop.permute.xlu2 %1089 }
 0x150   :  { %v1075_v2 = vpop.permute.xlu1 %1074  ;;  %v1100_v44 = vperm.slane %v1090_v50, %v2445_v24 }
 0x151   :  { %v1095_v16 = vperm.slane %v1075_v2, %v2445_v24  ;;  %v1527_v40 = vpop.permute.xlu0 %1526  ;;  %v1540_v2 = vperm.slane %v1518_v32, %v2445_v24 }
 0x153   :  { %v1102_v18 = vsel %vm201_vm1, %v1095_v16, %v1094_v17  ;;  %v1543_v17 = vperm.slane %v1527_v40, %v2445_v24 }
 0x154   :  { %v1103_v49 = vsel %vm3461_vm2, %v1096_v23, %v1102_v18 }
 0x155   :  { %v1104_v34 = vsel %vm3457_vm3, %v1097_v31, %v1103_v49 }
 0x157   :  { %v1521_v38 = vpop.permute.xlu2 %1520 }
 0x158   :  { %v1084_v20 = vpop.permute.xlu1 %1083  ;;  %v1541_v54 = vperm.slane %v1521_v38, %v2445_v24 }
 0x159   :  { %v1098_v63 = vperm.slane %v1084_v20, %v2445_v24  ;;  %v1536_v18 = vpop.permute.xlu0 %1535 }
 0x15a   :  { %v1548_v16 = vsel %vm201_vm1, %v1541_v54, %v1540_v2 }
 0x15b   :  { %v1105_v37 = vsel %vm3456_vm4, %v1098_v63, %v1104_v34  ;;  %v1546_v34 = vperm.slane %v1536_v18, %v2445_v24 }
 0x15c   :  { %v1106_v29 = vsel %vm3455_vm5, %v1099_v43, %v1105_v37 }
 0x15d   :  { %v1107_v48 = vsel %vm3449_vm6, %v1100_v44, %v1106_v29 }
 0x15f   :  { %v1530_v1 = vpop.permute.xlu2 %1529 }
 0x160   :  { %v1093_v0 = vpop.permute.xlu1 %1092  ;;  %v1544_v49 = vperm.slane %v1530_v1, %v2445_v24 }
 0x161   :  { %v1101_v26 = vperm.slane %v1093_v0, %v2445_v24 }
 0x163   :  { %v1108_v46 = vsel %vm3448_vm7, %v1101_v26, %v1107_v48 }
 0x164   :  { %v1110_v57 = vsel %vm3447_vm8, %v1108_v46, -inf }
 0x165   :  { %1111 = vmax.xlane.f32.xlu0 %v1110_v57 }
 0x167   :  { %v1539_v20 = vpop.permute.xlu2 %1538 }
 0x168   :  { %v1524_v10 = vpop.permute.xlu1 %1523  ;;  %v1547_v37 = vperm.slane %v1539_v20, %v2445_v24 }
 0x169   :  { %v1542_v51 = vperm.slane %v1524_v10, %v2445_v24 }
 0x16b   :  { %v1549_v50 = vsel %vm3461_vm2, %v1542_v51, %v1548_v16 }
 0x16c   :  { %v1550_v23 = vsel %vm3457_vm3, %v1543_v17, %v1549_v50 }
 0x16d   :  { %v1551_v32 = vsel %vm3456_vm4, %v1544_v49, %v1550_v23 }
 0x170   :  { %v1533_v31 = vpop.permute.xlu1 %1532 }
 0x171   :  { %v1545_v63 = vperm.slane %v1533_v31, %v2445_v24 }
 0x173   :  { %v1552_v38 = vsel %vm3455_vm5, %v1545_v63, %v1551_v32 }
 0x174   :  { %v1553_v43 = vsel %vm3449_vm6, %v1546_v34, %v1552_v38 }
 0x175   :  { %v1554_v29 = vsel %vm3448_vm7, %v1547_v37, %v1553_v43 }
 0x176   :  { %v1556_v44 = vsel %vm3447_vm8, %v1554_v29, -inf }
 0x177   :  { %1557 = vmax.xlane.f32.xlu2 %v1556_v44 }
 0x1aa   :  { %v219_v0 = vpop.xlane.xlu1 %218 }
 0x1ab   :  { %v222_v26 = vperm.slane %v219_v0, 1  ;;  %v221_v48 = vperm.slane %v219_v0, 0  ;;  %v224_v46 = vperm.slane %v219_v0, 3  ;;  %v223_v57 = vperm.slane %v219_v0, 2 }
 0x1ac   :  { %v226_v50 = vperm.slane %v219_v0, 5  ;;  %v225_v18 = vperm.slane %v219_v0, 4  ;;  %v227_v63 = vperm.slane %v219_v0, 6 }
 0x1ad   :  { %v238_v40 = vsub.f32 %v2284_v61, %v222_v26  ;;  %v237_v1 = vsub.f32 %v2286_v62, %v221_v48  ;;  %v240_v2 = vsub.f32 %v2303_v7, %v224_v46  ;;  %v239_v51 = vsub.f32 %v2299_v4, %v223_v57 }
 0x1ae   :  { %v242_v49 = vsub.f32 %v2320_v14, %v226_v50  ;;  %v241_v62 = vsub.f32 %v2318_v13, %v225_v18  ;;  %v228_v4 = vperm.slane %v219_v0, 7  ;;  %v243_v38 = vsub.f32 %v2282_v60, %v227_v63 }
 0x1af   :  { %v247_v54 = vmul.f32 1.442695, %v238_v40  ;;  %v245_v10 = vmul.f32 1.442695, %v237_v1  ;;  %v251_v16 = vmul.f32 1.442695, %v240_v2 }
 0x1b0   :  { %v249_v17 = vmul.f32 1.442695, %v239_v51  ;;  %v255_v31 = vmul.f32 1.442695, %v242_v49  ;;  %v253_v34 = vmul.f32 1.442695, %v241_v62  ;;  %v244_v37 = vsub.f32 %v2331_v19, %v228_v4 }
 0x1b1   :  { %1948 = vpow2.f32 %v247_v54  ;;  %v257_v48 = vmul.f32 1.442695, %v243_v38 }
 0x1b2   :  { %1950 = vpow2.f32 %v245_v10  ;;  %v259_v0 = vmul.f32 1.442695, %v244_v37 }
 0x1b3   :  { %1952 = vpow2.f32 %v251_v16 }
 0x1b4   :  { %1954 = vpow2.f32 %v249_v17 }
 0x1b5   :  { %1956 = vpow2.f32 %v255_v31 }
 0x1b6   :  { %1958 = vpow2.f32 %v253_v34 }
 0x1b7   :  { %v1949_v23 = vpop.eup %1948  ;;  %1960 = vpow2.f32 %v259_v0 }
 0x1b8   :  { %v1951_v20 = vpop.eup %1950  ;;  %v2517_v61 = vmul.f32 %v1949_v23, %v2274_v55  ;;  %1962 = vpow2.f32 %v257_v48 }
 0x1b9   :  { %v2521_v7 = vmul.f32 %v1951_v20, %v2274_v55  ;;  %v1953_v32 = vpop.eup %1952 }
 0x1ba   :  { %281 = vperm.xlu0 %1942, %v2517_v61   ;;  %v1955_v14 = vpop.eup %1954  ;;  %v2528_v13 = vmul.f32 %v1953_v32, %v2274_v55 }
 0x1bb   :  { %278 = vperm.xlu2 %1941, %v2521_v7   ;;  %v2531_v29 = vmul.f32 %v1955_v14, %v2274_v55  ;;  %v1957_v57 = vpop.eup %1956 }
 0x1bc   :  { %v1959_v40 = vpop.eup %1958  ;;  %v2539_v2 = vmul.f32 %v1957_v57, %v2274_v55 }
 0x1bd   :  { %v2543_v16 = vmul.f32 %v1959_v40, %v2274_v55  ;;  %v1961_v18 = vpop.eup %1960 }
 0x1be   :  { %v1963_v49 = vpop.eup %1962  ;;  %v2553_v31 = vmul.f32 %v1961_v18, %v2274_v55 }
 0x1bf   :  { %v2558_v34 = vmul.f32 %v1963_v49, %v2274_v55 }
 0x1c1   :  { %v666_v43 = vpop.xlane.xlu1 %665 }
 0x1c2   :  { %287 = vperm.xlu0 %1942, %v2528_v13   ;;  %v668_v44 = vperm.slane %v666_v43, 0  ;;  %v672_v26 = vperm.slane %v666_v43, 4  ;;  %v669_v19 = vperm.slane %v666_v43, 1  ;;  %v670_v60 = vperm.slane %v666_v43, 2 }
 0x1c3   :  { %284 = vperm.xlu2 %1941, %v2531_v29   ;;  %v675_v50 = vperm.slane %v666_v43, 7  ;;  %v674_v32 = vperm.slane %v666_v43, 6 }
 0x1c4   :  { %v684_v46 = vsub.f32 %v2346_v25, %v668_v44  ;;  %v688_v54 = vsub.f32 %v2306_v8, %v672_v26  ;;  %v685_v10 = vsub.f32 %v2335_v21, %v669_v19  ;;  %v686_v51 = vsub.f32 %v2363_v33, %v670_v60 }
 0x1c5   :  { %v671_v8 = vperm.slane %v666_v43, 3  ;;  %v673_v21 = vperm.slane %v666_v43, 5  ;;  %v691_v62 = vsub.f32 %v2323_v15, %v675_v50  ;;  %v690_v0 = vsub.f32 %v2367_v35, %v674_v32 }
 0x1c6   :  { %v692_v1 = vmul.f32 1.442695, %v684_v46  ;;  %v700_v25 = vmul.f32 1.442695, %v688_v54  ;;  %v694_v17 = vmul.f32 1.442695, %v685_v10 }
 0x1c7   :  { %v696_v23 = vmul.f32 1.442695, %v686_v51  ;;  %v687_v4 = vsub.f32 %v2350_v27, %v671_v8  ;;  %v689_v63 = vsub.f32 %v2378_v39, %v673_v21  ;;  %v706_v15 = vmul.f32 1.442695, %v691_v62 }
 0x1c8   :  { %1964 = vpow2.f32 %v692_v1  ;;  %v704_v35 = vmul.f32 1.442695, %v690_v0 }
 0x1c9   :  { %1966 = vpow2.f32 %v700_v25  ;;  %v698_v14 = vmul.f32 1.442695, %v687_v4  ;;  %v702_v27 = vmul.f32 1.442695, %v689_v63 }
 0x1ca   :  { %293 = vperm.xlu0 %1942, %v2539_v2   ;;  %1968 = vpow2.f32 %v694_v17 }
 0x1cb   :  { %290 = vperm.xlu2 %1941, %v2543_v16   ;;  %1970 = vpow2.f32 %v696_v23 }
 0x1cc   :  { %1972 = vpow2.f32 %v706_v15 }
 0x1cd   :  { %1974 = vpow2.f32 %v698_v14 }
 0x1ce   :  { %v1965_v20 = vpop.eup %1964  ;;  %1976 = vpow2.f32 %v702_v27 }
 0x1cf   :  { %v2549_v33 = vmul.f32 %v1965_v20, %v2297_v3  ;;  %v1967_v37 = vpop.eup %1966  ;;  %1978 = vpow2.f32 %v704_v35 }
 0x1d0   :  { %v1969_v38 = vpop.eup %1968  ;;  %v2564_v39 = vmul.f32 %v1967_v37, %v2297_v3 }
 0x1d1   :  { %725 = vperm.xlu1 %1940, %v2549_v33   ;;  %v1971_v44 = vpop.eup %1970  ;;  %v2569_v26 = vmul.f32 %v1969_v38, %v2297_v3 }
 0x1d2   :  { %299 = vperm.xlu0 %1942, %v2553_v31   ;;  %v2573_v43 = vmul.f32 %v1971_v44, %v2297_v3  ;;  %v1973_v1 = vpop.eup %1972 }
 0x1d3   :  { %296 = vperm.xlu2 %1941, %v2558_v34   ;;  %v1975_v10 = vpop.eup %1974  ;;  %v2586_v8 = vmul.f32 %v1973_v1, %v2297_v3 }
 0x1d4   :  { %v1977_v50 = vpop.eup %1976 }
 0x1d5   :  { %v2595_v23 = vmul.f32 %v1977_v50, %v2297_v3 }
 0x1d8   :  { %v2566_v55 = vpop.xlane.xlu0 %1111 }
 0x1d9   :  { %737 = vperm.xlu1 %1940, %v2564_v39   ;;  %v1116_v48 = vperm.slane %v2566_v55, 2  ;;  %v1114_v19 = vperm.slane %v2566_v55, 0  ;;  %v1119_v46 = vperm.slane %v2566_v55, 5  ;;  %v1115_v40 = vperm.slane %v2566_v55, 1 }
 0x1da   :  { %728 = vperm.xlu0 %1942, %v2569_v26   ;;  %v1117_v54 = vperm.slane %v2566_v55, 3  ;;  %v1118_v49 = vperm.slane %v2566_v55, 4  ;;  %v1120_v62 = vperm.slane %v2566_v55, 6  ;;  %v1121_v38 = vperm.slane %v2566_v55, 7 }
 0x1db   :  { %731 = vperm.xlu2 %1941, %v2573_v43   ;;  %v1132_v60 = vsub.f32 %v2338_v22, %v1116_v48  ;;  %v1130_v57 = vsub.f32 %v2393_v45, %v1114_v19  ;;  %v1135_v17 = vsub.f32 %v2353_v28, %v1119_v46  ;;  %v1131_v22 = vsub.f32 %v2382_v41, %v1115_v40  ;;  %v1979_v41 = vpop.eup %1978 }
 0x1dc   :  { %v2590_v45 = vmul.f32 %v1975_v10, %v2297_v3  ;;  %v1133_v18 = vsub.f32 %v2408_v58, %v1117_v54  ;;  %v1134_v15 = vsub.f32 %v2397_v47, %v1118_v49  ;;  %v2606_v32 = vmul.f32 %v1979_v41, %v2297_v3 }
 0x1dd   :  { %v1142_v51 = vmul.f32 1.442695, %v1132_v60  ;;  %v1138_v25 = vmul.f32 1.442695, %v1130_v57  ;;  %v1148_v28 = vmul.f32 1.442695, %v1135_v17  ;;  %v1136_v14 = vsub.f32 %v2418_v5, %v1120_v62 }
 0x1de   :  { %v1140_v21 = vmul.f32 1.442695, %v1131_v22  ;;  %v1144_v20 = vmul.f32 1.442695, %v1133_v18  ;;  %v1146_v47 = vmul.f32 1.442695, %v1134_v15  ;;  %v1137_v60 = vsub.f32 %v2410_v59, %v1121_v38 }
 0x1df   :  { %1980 = vpow2.f32 %v1142_v51  ;;  %v1150_v48 = vmul.f32 1.442695, %v1136_v14 }
 0x1e0   :  { %1982 = vpow2.f32 %v1138_v25  ;;  %v1152_v59 = vmul.f32 1.442695, %v1137_v60 }
 0x1e1   :  { %746 = vperm.xlu1 %1940, %v2586_v8   ;;  %1984 = vpow2.f32 %v1148_v28 }
 0x1e2   :  { %734 = vperm.xlu0 %1942, %v2590_v45   ;;  %1986 = vpow2.f32 %v1140_v21 }
 0x1e3   :  { %740 = vperm.xlu2 %1941, %v2595_v23   ;;  %1988 = vpow2.f32 %v1144_v20 }
 0x1e4   :  { %1990 = vpow2.f32 %v1146_v47 }
 0x1e5   :  { %v1981_v4 = vpop.eup %1980  ;;  %1992 = vpow2.f32 %v1150_v48 }
 0x1e6   :  { %v1983_v63 = vpop.eup %1982  ;;  %v2602_v58 = vmul.f32 %v1981_v4, %v2310_v9 }
 0x1e7   :  { %v2611_v37 = vmul.f32 %v1983_v63, %v2310_v9  ;;  %v1985_v3 = vpop.eup %1984 }
 0x1e8   :  { %v1987_v35 = vpop.eup %1986  ;;  %v2619_v57 = vmul.f32 %v1985_v3, %v2310_v9 }
 0x1e9   :  { %1177 = vperm.xlu1 %1940, %v2602_v58   ;;  %v1989_v46 = vpop.eup %1988  ;;  %v2623_v1 = vmul.f32 %v1987_v35, %v2310_v9 }
 0x1ea   :  { %743 = vperm.xlu0 %1942, %v2606_v32   ;;  %v1558_v27 = vpop.xlane.xlu2 %1557  ;;  %v1991_v17 = vpop.eup %1990 }
 0x1eb   :  { %1171 = vperm.xlu2 %1941, %v2611_v37   ;;  %v1560_v44 = vperm.slane %v1558_v27, 0  ;;  %v1563_v0 = vperm.slane %v1558_v27, 3  ;;  %v1561_v19 = vperm.slane %v1558_v27, 1  ;;  %v1566_v10 = vperm.slane %v1558_v27, 6  ;;  %v1993_v22 = vpop.eup %1992 }
 0x1ec   :  { %v1564_v50 = vperm.slane %v1558_v27, 4  ;;  %v2638_v49 = vmul.f32 %v1991_v17, %v2310_v9  ;;  %v2642_v20 = vmul.f32 %v1993_v22, %v2310_v9  ;;  %v1565_v62 = vperm.slane %v1558_v27, 5 }
 0x1ed   :  { %v1576_v5 = vsub.f32 %v2370_v36, %v1560_v44  ;;  %v1579_v55 = vsub.f32 %v2385_v42, %v1563_v0  ;;  %v1577_v54 = vsub.f32 %v2428_v11, %v1561_v19  ;;  %v2628_v36 = vmul.f32 %v1989_v46, %v2310_v9 }
 0x1ee   :  { %v1562_v42 = vperm.slane %v1558_v27, 2  ;;  %v1582_v11 = vsub.f32 %v2400_v56, %v1566_v10  ;;  %v1580_v41 = vsub.f32 %v2436_v12, %v1564_v50  ;;  %v1567_v15 = vperm.slane %v1558_v27, 7 }
 0x1ef   :  { %v1584_v40 = vmul.f32 1.442695, %v1576_v5  ;;  %v1590_v51 = vmul.f32 1.442695, %v1579_v55  ;;  %v1586_v25 = vmul.f32 1.442695, %v1577_v54  ;;  %v1581_v12 = vsub.f32 %v2430_v53, %v1565_v62 }
 0x1f0   :  { %v1578_v28 = vsub.f32 %v2420_v6, %v1562_v42  ;;  %v1596_v56 = vmul.f32 1.442695, %v1582_v11  ;;  %v1592_v63 = vmul.f32 1.442695, %v1580_v41  ;;  %v1583_v0 = vsub.f32 %v2441_v52, %v1567_v15 }
 0x1f1   :  { %1186 = vperm.xlu1 %1940, %v2619_v57   ;;  %1994 = vpow2.f32 %v1584_v40  ;;  %v1594_v27 = vmul.f32 1.442695, %v1581_v12 }
 0x1f2   :  { %1174 = vperm.xlu0 %1942, %v2623_v1   ;;  %1996 = vpow2.f32 %v1152_v59  ;;  %v1588_v6 = vmul.f32 1.442695, %v1578_v28  ;;  %v1598_v48 = vmul.f32 1.442695, %v1583_v0 }
 0x1f3   :  { %1180 = vperm.xlu2 %1941, %v2628_v36   ;;  %1998 = vpow2.f32 %v1590_v51 }
 0x1f4   :  { %2000 = vpow2.f32 %v1586_v25 }
 0x1f5   :  { %2002 = vpow2.f32 %v1596_v56 }
 0x1f6   :  { %2004 = vpow2.f32 %v1588_v6 }
 0x1f7   :  { %v1995_v18 = vpop.eup %1994  ;;  %2006 = vpow2.f32 %v1592_v63 }
 0x1f8   :  { %v2635_v21 = vmul.f32 %v1995_v18, %v2359_v30  ;;  %v1997_v4 = vpop.eup %1996  ;;  %2008 = vpow2.f32 %v1594_v27 }
 0x1f9   :  { %v1999_v14 = vpop.eup %1998  ;;  %v2652_v47 = vmul.f32 %v1997_v4, %v2310_v9  ;;  %2010 = vpow2.f32 %v1598_v48 }
 0x1fa   :  { %1617 = vperm.xlu1 %1940, %v2635_v21   ;;  %1183 = vperm.xlu0 %1942, %v2638_v49   ;;  %v2001_v38 = vpop.eup %2000  ;;  %v2649_v44 = vmul.f32 %v1999_v14, %v2359_v30 }
 0x1fb   :  { %1189 = vperm.xlu2 %1941, %v2642_v20   ;;  %3463 = vst [vmem:[#allocation10_spill] sm:$0xff] %v2652_v47  ;;  %v2656_v3 = vmul.f32 %v2001_v38, %v2359_v30  ;;  %v2003_v53 = vpop.eup %2002 }
 0x1fc   :  { %v2005_v19 = vpop.eup %2004  ;;  %v2662_v9 = vmul.f32 %v2003_v53, %v2359_v30 }
 0x1fd   :  { %v2007_v35 = vpop.eup %2006  ;;  %v2665_v52 = vmul.f32 %v2005_v19, %v2359_v30 }
 0x1fe   :  { %3464 = vst [vmem:[#allocation11_spill] sm:$0xff] %v2662_v9  ;;  %v2668_v5 = vmul.f32 %v2007_v35, %v2359_v30  ;;  %v2009_v46 = vpop.eup %2008 }
 0x1ff   :  { %3465 = vst [vmem:[#allocation12_spill] sm:$0xff] %v2665_v52  ;;  %v2011_v60 = vpop.eup %2010  ;;  %v2674_v40 = vmul.f32 %v2009_v46, %v2359_v30 }
 0x200   :  { %3466 = vst [vmem:[#allocation13_spill] sm:$0xff] %v2668_v5  ;;  %v2677_v55 = vmul.f32 %v2011_v60, %v2359_v30 }
 0x201   :  { %3467 = vst [vmem:[#allocation14_spill] sm:$0xff] %v2674_v40 }
 0x202   :  { %1626 = vperm.xlu1 %1940, %v2649_v44   ;;  %1192 = vperm.xlu0 %1942, %v2652_v47   ;;  %3468 = vst [vmem:[#allocation15_spill] sm:$0xff] %v2677_v55 }
 0x203   :  { %1620 = vperm.xlu2 %1941, %v2656_v3  }
 0x20a   :  { %1635 = vperm.xlu1 %1940, %v2662_v9   ;;  %1623 = vperm.xlu0 %1942, %v2665_v52  }
 0x20b   :  { %1629 = vperm.xlu2 %1941, %v2668_v5  }
 0x212   :  { %1632 = vperm.xlu0 %1942, %v2674_v40  }
 0x213   :  { %1638 = vperm.xlu2 %1941, %v2677_v55  }
 0x215   :  { %v279_v54 = vpop.permute.xlu2 %278 }
 0x216   :  { %v301_v17 = vperm.slane %v279_v54, %v2445_v24 }
 0x21d   :  { %v285_v59 = vpop.permute.xlu2 %284 }
 0x21e   :  { %v303_v30 = vperm.slane %v285_v59, %v2445_v24 }
 0x225   :  { %v291_v10 = vpop.permute.xlu2 %290 }
 0x226   :  { %v305_v62 = vperm.slane %v291_v10, %v2445_v24 }
 0x22c   :  { %v282_v51 = vpop.permute.xlu0 %281 }
 0x22d   :  { %v297_v42 = vpop.permute.xlu2 %296  ;;  %v302_v50 = vperm.slane %v282_v51, %v2445_v24 }
 0x22e   :  { %v307_v14 = vperm.slane %v297_v42, %v2445_v24 }
 0x22f   :  { %v309_v22 = vsel %vm201_vm1, %v302_v50, %v301_v17 }
 0x230   :  { %v310_v41 = vsel %vm3461_vm2, %v303_v30, %v309_v22 }
 0x234   :  { %v288_v25 = vpop.permute.xlu0 %287 }
 0x235   :  { %v304_v11 = vperm.slane %v288_v25, %v2445_v24  ;;  %v732_v28 = vpop.permute.xlu2 %731 }
 0x236   :  { %v750_v42 = vperm.slane %v732_v28, %v2445_v24 }
 0x237   :  { %v311_v56 = vsel %vm3457_vm3, %v304_v11, %v310_v41 }
 0x238   :  { %v312_v4 = vsel %vm3456_vm4, %v305_v62, %v311_v56 }
 0x23c   :  { %v294_v18 = vpop.permute.xlu0 %293 }
 0x23d   :  { %v306_v6 = vperm.slane %v294_v18, %v2445_v24  ;;  %v741_v53 = vpop.permute.xlu2 %740 }
 0x23e   :  { %v753_v18 = vperm.slane %v741_v53, %v2445_v24 }
 0x23f   :  { %v313_v63 = vsel %vm3455_vm5, %v306_v6, %v312_v4 }
 0x240   :  { %v314_v0 = vsel %vm3449_vm6, %v307_v14, %v313_v63 }
 0x243   :  { %v726_v15 = vpop.permute.xlu1 %725 }
 0x244   :  { %v300_v38 = vpop.permute.xlu0 %299  ;;  %v748_v60 = vperm.slane %v726_v15, %v2445_v24 }
 0x245   :  { %v308_v12 = vperm.slane %v300_v38, %v2445_v24  ;;  %v1172_v54 = vpop.permute.xlu2 %1171 }
 0x247   :  { %v315_v27 = vsel %vm3448_vm7, %v308_v12, %v314_v0 }
 0x248   :  { %v317_v48 = vsel %vm3447_vm8, %v315_v27, 0.0  ;;  %v1194_v27 = vperm.slane %v1172_v54, %v2445_v24 }
 0x249   :  { %318 = vadd.xlane.f32.xlu2 %v317_v48 }
 0x24b   :  { %v738_v19 = vpop.permute.xlu1 %737 }
 0x24c   :  { %v729_v35 = vpop.permute.xlu0 %728  ;;  %v752_v22 = vperm.slane %v738_v19, %v2445_v24 }
 0x24d   :  { %v749_v46 = vperm.slane %v729_v35, %v2445_v24  ;;  %v1181_v41 = vpop.permute.xlu2 %1180 }
 0x24f   :  { %v756_v10 = vsel %vm201_vm1, %v749_v46, %v748_v60  ;;  %v1197_v46 = vperm.slane %v1181_v41, %v2445_v24 }
 0x250   :  { %v757_v50 = vsel %vm3461_vm2, %v750_v42, %v756_v10 }
 0x253   :  { %v747_v59 = vpop.permute.xlu1 %746 }
 0x254   :  { %v735_v51 = vpop.permute.xlu0 %734  ;;  %v755_v62 = vperm.slane %v747_v59, %v2445_v24 }
 0x255   :  { %v751_v25 = vperm.slane %v735_v51, %v2445_v24  ;;  %v1190_v0 = vpop.permute.xlu2 %1189 }
 0x257   :  { %v758_v17 = vsel %vm3457_vm3, %v751_v25, %v757_v50  ;;  %v1200_v50 = vperm.slane %v1190_v0, %v2445_v24 }
 0x258   :  { %v759_v11 = vsel %vm3456_vm4, %v752_v22, %v758_v17 }
 0x259   :  { %v760_v28 = vsel %vm3455_vm5, %v753_v18, %v759_v11 }
 0x25b   :  { %v1178_v30 = vpop.permute.xlu1 %1177 }
 0x25c   :  { %v744_v56 = vpop.permute.xlu0 %743  ;;  %v1196_v48 = vperm.slane %v1178_v30, %v2445_v24 }
 0x25d   :  { %v754_v6 = vperm.slane %v744_v56, %v2445_v24  ;;  %v1621_v51 = vpop.permute.xlu2 %1620 }
 0x25f   :  { %v761_v4 = vsel %vm3449_vm6, %v754_v6, %v760_v28  ;;  %v1641_v28 = vperm.slane %v1621_v51, %v2445_v24 }
 0x260   :  { %v762_v63 = vsel %vm3448_vm7, %v755_v62, %v761_v4 }
 0x261   :  { %v764_v15 = vsel %vm3447_vm8, %v762_v63, 0.0 }
 0x262   :  { %765 = vadd.xlane.f32.xlu0 %v764_v15 }
 0x263   :  { %v1187_v38 = vpop.permute.xlu1 %1186 }
 0x264   :  { %v1175_v14 = vpop.permute.xlu0 %1174  ;;  %v1199_v25 = vperm.slane %v1187_v38, %v2445_v24 }
 0x265   :  { %v1195_v12 = vperm.slane %v1175_v14, %v2445_v24  ;;  %v1630_v56 = vpop.permute.xlu2 %1629 }
 0x266   :  { %v1644_v0 = vperm.slane %v1630_v56, %v2445_v24 }
 0x267   :  { %v1202_v53 = vsel %vm201_vm1, %v1195_v12, %v1194_v27 }
 0x268   :  { %v1203_v19 = vsel %vm3461_vm2, %v1196_v48, %v1202_v53 }
 0x269   :  { %v1204_v10 = vsel %vm3457_vm3, %v1197_v46, %v1203_v19 }
 0x26c   :  { %v1184_v35 = vpop.permute.xlu0 %1183  ;;  %v1618_v59 = vpop.permute.xlu1 %1617 }
 0x26d   :  { %v1198_v60 = vperm.slane %v1184_v35, %v2445_v24  ;;  %v1640_v6 = vperm.slane %v1618_v59, %v2445_v24  ;;  %v1639_v27 = vpop.permute.xlu2 %1638 }
 0x26e   :  { %v1647_v46 = vperm.slane %v1639_v27, %v2445_v24 }
 0x26f   :  { %v1205_v42 = vsel %vm3456_vm4, %v1198_v60, %v1204_v10  ;;  %v1648_v63 = vsel %vm201_vm1, %v1641_v28, %v1640_v6 }
 0x270   :  { %v1206_v54 = vsel %vm3455_vm5, %v1199_v25, %v1205_v42 }
 0x271   :  { %v1207_v11 = vsel %vm3449_vm6, %v1200_v50, %v1206_v54 }
 0x274   :  { %v1193_v17 = vpop.permute.xlu0 %1192  ;;  %v1627_v41 = vpop.permute.xlu1 %1626 }
 0x275   :  { %v1201_v22 = vperm.slane %v1193_v17, %v2445_v24  ;;  %v1643_v14 = vperm.slane %v1627_v41, %v2445_v24 }
 0x277   :  { %v1208_v30 = vsel %vm3448_vm7, %v1201_v22, %v1207_v11 }
 0x278   :  { %v1210_v18 = vsel %vm3447_vm8, %v1208_v30, 0.0 }
 0x279   :  { %1211 = vadd.xlane.f32.xlu1 %v1210_v18 }
 0x27c   :  { %v1624_v62 = vpop.permute.xlu0 %1623  ;;  %v1636_v38 = vpop.permute.xlu1 %1635 }
 0x27d   :  { %v1642_v4 = vperm.slane %v1624_v62, %v2445_v24  ;;  %v1646_v19 = vperm.slane %v1636_v38, %v2445_v24 }
 0x27f   :  { %v1649_v15 = vsel %vm3461_vm2, %v1642_v4, %v1648_v63 }
 0x280   :  { %v1650_v12 = vsel %vm3457_vm3, %v1643_v14, %v1649_v15 }
 0x281   :  { %v1651_v35 = vsel %vm3456_vm4, %v1644_v0, %v1650_v12 }
 0x284   :  { %v1633_v53 = vpop.permute.xlu0 %1632 }
 0x285   :  { %v1645_v48 = vperm.slane %v1633_v53, %v2445_v24 }
 0x287   :  { %v1652_v60 = vsel %vm3455_vm5, %v1645_v48, %v1651_v35 }
 0x288   :  { %v1653_v59 = vsel %vm3449_vm6, %v1646_v19, %v1652_v60 }
 0x289   :  { %v1654_v10 = vsel %vm3448_vm7, %v1647_v46, %v1653_v59 }
 0x28a   :  { %v1656_v51 = vsel %vm3447_vm8, %v1654_v10, 0.0 }
 0x28b   :  { %1657 = vadd.xlane.f32.xlu2 %v1656_v51 }
 0x2bc   :  { %v319_v42 = vpop.xlane.xlu2 %318 }
 0x2bd   :  { %v320_v25 = vmax.f32 %v319_v42, 1e-30 }
 0x2bf   :  { %v323_v54 = vperm.slane %v320_v25, 1  ;;  %v2745_v50 = vperm.slane %v320_v25, 0  ;;  %v2747_v17 = vperm.slane %v320_v25, 2  ;;  %v2749_v22 = vperm.slane %v320_v25, 4 }
 0x2c0   :  { %v2752_v11 = vperm.slane %v320_v25, 3  ;;  %v2755_v41 = vperm.slane %v320_v25, 6  ;;  %v2763_v4 = vperm.slane %v320_v25, 5  ;;  %v2765_v63 = vperm.slane %v320_v25, 7 }
 0x2c1   :  { %2012 = vrcp.f32 %v323_v54  ;;  %v362_v30 = vand.u32 2147483647, %v323_v54  ;;  %v364_v18 = vand.u32 2147483648, %v323_v54  ;;  %v347_v56 = vand.u32 2147483647, %v2745_v50 }
 0x2c2   :  { %2014 = vrcp.f32 %v2745_v50  ;;  %v349_v6 = vand.u32 2147483648, %v2745_v50  ;;  %v379_v62 = vand.u32 2147483648, %v2747_v17  ;;  %vm358_vm9 = vweird.f32 %v323_v54 }
 0x2c3   :  { %2016 = vrcp.f32 %v2747_v17  ;;  %vm343_vm10 = vweird.f32 %v2745_v50  ;;  %vm2767_vm11 = vcmp.eq.f32.partialorder %v362_v30, 8.507059e+37  ;;  %v365_v12 = vor.u32 1.1754944e-38, %v364_v18 }
 0x2c4   :  { %2018 = vrcp.f32 %v2749_v22  ;;  %vm2775_vm12 = vcmp.eq.f32.partialorder %v347_v56, 8.507059e+37  ;;  %v350_v48 = vor.u32 1.1754944e-38, %v349_v6  ;;  %vm373_vm13 = vweird.f32 %v2747_v17 }
 0x2c5   :  { %2020 = vrcp.f32 %v2752_v11  ;;  %v377_v19 = vand.u32 2147483647, %v2747_v17  ;;  %v407_v35 = vand.u32 2147483647, %v2749_v22  ;;  %v2784_v59 = vor.u32 1.1754944e-38, %v379_v62 }
 0x2c6   :  { %2022 = vrcp.f32 %v2755_v41  ;;  %v409_v10 = vand.u32 2147483648, %v2749_v22  ;;  %vm403_vm14 = vweird.f32 %v2749_v22  ;;  %v392_v25 = vand.u32 2147483647, %v2752_v11 }
 0x2c7   :  { %v2013_v28 = vpop.eup %2012  ;;  %v394_v30 = vand.u32 2147483648, %v2752_v11  ;;  %2024 = vrcp.f32 %v2763_v4  ;;  %vm388_vm0 = vweird.f32 %v2752_v11  ;;  %vm2799_vm6 = vcmp.eq.f32.partialorder %v377_v19, 8.507059e+37 }
 0x2c8   :  { %v2015_v15 = vpop.eup %2014  ;;  %v354_v14 = vmul.f32 %v2013_v28, %v323_v54  ;;  %vm359_vm15 = vweird.f32 %v2013_v28  ;;  %v439_v55 = vand.u32 2147483648, %v2755_v41  ;;  %vm2809_vm3 = vcmp.eq.f32.partialorder %v407_v35, 8.507059e+37 }
 0x2c9   :  { %v2772_v0 = vpop.eup %2016  ;;  %v339_v27 = vmul.f32 %v2015_v15, %v2745_v50  ;;  %vm344_vm8 = vweird.f32 %v2015_v15  ;;  %vm360_vm5 = vmor %vm358_vm9, %vm359_vm15  ;;  %2026 = vrcp.f32 %v2765_v63 }
 0x2ca   :  { %v355_v46 = vsub.f32 1.0, %v354_v14  ;;  %v369_v60 = vmul.f32 %v2772_v0, %v2747_v17  ;;  %v2787_v51 = vpop.eup %2018  ;;  %vm374_vm7 = vweird.f32 %v2772_v0  ;;  %vm345_vm2 = vmor %vm343_vm10, %vm344_vm8  ;;  %vm433_vm10 = vweird.f32 %v2755_v41 }
 0x2cb   :  { %v340_v42 = vsub.f32 1.0, %v339_v27  ;;  %v2793_v18 = vpop.eup %2020  ;;  %v399_v62 = vmul.f32 %v2787_v51, %v2749_v22  ;;  %vm404_vm4 = vweird.f32 %v2787_v51 }
 0x2cc   :  { %v356_v56 = vmul.f32 %v2013_v28, %v355_v46  ;;  %v370_v6 = vsub.f32 1.0, %v369_v60  ;;  %v384_v24 = vmul.f32 %v2793_v18, %v2752_v11  ;;  %v2023_v40 = vpop.eup %2022  ;;  %vm389_vm9 = vweird.f32 %v2793_v18 }
 0x2cd   :  { %v341_v14 = vmul.f32 %v2015_v15, %v340_v42  ;;  %v400_v52 = vsub.f32 1.0, %v399_v62  ;;  %v429_v47 = vmul.f32 %v2023_v40, %v2755_v41  ;;  %vm434_vm8 = vweird.f32 %v2023_v40 }
 0x2ce   :  { %v357_v46 = vadd.f32 %v2013_v28, %v356_v56  ;;  %v371_v60 = vmul.f32 %v2772_v0, %v370_v6  ;;  %v385_v9 = vsub.f32 1.0, %v384_v24  ;;  %v2820_v6 = vpop.eup %2024 }
 0x2cf   :  { %v342_v42 = vadd.f32 %v2015_v15, %v341_v14  ;;  %v401_v54 = vmul.f32 %v2787_v51, %v400_v52  ;;  %v430_v14 = vsub.f32 1.0, %v429_v47 }
 0x2d0   :  { %v361_v5 = vsel %vm360_vm5, %v2013_v28, %v357_v46  ;;  %v372_v56 = vadd.f32 %v2772_v0, %v371_v60  ;;  %v386_v24 = vmul.f32 %v2793_v18, %v385_v9  ;;  %vm2832_vm5 = vmor %vm373_vm13, %vm374_vm7  ;;  %vm2850_vm7 = vcmp.eq.f32.partialorder %v392_v25, 8.507059e+37 }
 0x2d1   :  { %v366_v35 = vsel %vm2767_vm11, %v365_v12, %v361_v5  ;;  %v346_v62 = vsel %vm345_vm2, %v2015_v15, %v342_v42  ;;  %v402_v38 = vadd.f32 %v2787_v51, %v401_v54  ;;  %v431_v9 = vmul.f32 %v2023_v40, %v430_v14  ;;  %vm2846_vm2 = vmor %vm403_vm14, %vm404_vm4 }
 0x2d2   :  { %v367_v28 = vmul.f32 %v366_v35, %v2517_v61  ;;  %v351_v50 = vsel %vm2775_vm12, %v350_v48, %v346_v62  ;;  %v376_v61 = vsel %vm2832_vm5, %v2772_v0, %v372_v56  ;;  %v387_v47 = vadd.f32 %v2793_v18, %v386_v24  ;;  %vm2864_vm4 = vmor %vm388_vm0, %vm389_vm9 }
 0x2d3   :  { %v352_v5 = vmul.f32 %v351_v50, %v2521_v7  ;;  %v410_v15 = vor.u32 1.1754944e-38, %v409_v10  ;;  %v414_v7 = vmul.f32 %v2820_v6, %v2763_v4  ;;  %v406_v22 = vsel %vm2846_vm2, %v2787_v51, %v402_v38  ;;  %vm435_vm11 = vmor %vm433_vm10, %vm434_vm8 }
 0x2d4   :  { %470 = vperm.xlu0 %1942, %v367_v28   ;;  %v395_v48 = vor.u32 1.1754944e-38, %v394_v30  ;;  %v432_v10 = vadd.f32 %v2023_v40, %v431_v9  ;;  %v437_v25 = vand.u32 2147483647, %v2755_v41  ;;  %v381_v60 = vsel %vm2799_vm6, %v2784_v59, %v376_v61  ;;  %v2908_v28 = vpop.eup %2026 }
 0x2d5   :  { %467 = vperm.xlu1 %1940, %v352_v5   ;;  %v766_v0 = vpop.xlane.xlu0 %765  ;;  %v391_v51 = vsel %vm2864_vm4, %v2793_v18, %v387_v47  ;;  %v415_v11 = vsub.f32 1.0, %v414_v7  ;;  %v440_v56 = vor.u32 1.1754944e-38, %v439_v55  ;;  %v422_v30 = vand.u32 2147483647, %v2763_v4 }
 0x2d6   :  { %v2869_v46 = vmax.f32 %v766_v0, 1e-30  ;;  %v436_v42 = vsel %vm435_vm11, %v2023_v40, %v432_v10  ;;  %v411_v41 = vsel %vm2809_vm3, %v410_v15, %v406_v22  ;;  %v382_v18 = vmul.f32 %v381_v60, %v2531_v29 }
 0x2d7   :  { %v416_v54 = vmul.f32 %v2820_v6, %v415_v11  ;;  %v396_v40 = vsel %vm2850_vm7, %v395_v48, %v391_v51  ;;  %vm438_vm0 = vcmp.eq.f32.partialorder %v437_v25, 8.507059e+37  ;;  %vm419_vm6 = vweird.f32 %v2820_v6 }
 0x2d8   :  { %v2884_v59 = vperm.slane %v2869_v46, 2  ;;  %v2887_v27 = vperm.slane %v2869_v46, 1  ;;  %v441_v55 = vsel %vm438_vm0, %v440_v56, %v436_v42  ;;  %v424_v35 = vand.u32 2147483648, %v2763_v4 }
 0x2d9   :  { %v417_v19 = vadd.f32 %v2820_v6, %v416_v54  ;;  %v412_v62 = vmul.f32 %v411_v41, %v2543_v16  ;;  %vm418_vm3 = vweird.f32 %v2763_v4  ;;  %v397_v29 = vmul.f32 %v396_v40, %v2528_v13 }
 0x2da   :  { %2028 = vrcp.f32 %v2884_v59  ;;  %vm2900_vm12 = vmor %vm418_vm3, %vm419_vm6  ;;  %vm2904_vm13 = vcmp.eq.f32.partialorder %v422_v30, 8.507059e+37  ;;  %v442_v16 = vmul.f32 %v441_v55, %v2558_v34  ;;  %v824_v50 = vand.u32 2147483647, %v2884_v59 }
 0x2db   :  { %2030 = vrcp.f32 %v2887_v27  ;;  %v421_v4 = vsel %vm2900_vm12, %v2820_v6, %v417_v19  ;;  %v826_v13 = vand.u32 2147483648, %v2884_v59  ;;  %v425_v52 = vor.u32 1.1754944e-38, %v424_v35 }
 0x2dc   :  { %473 = vperm.xlu0 %1942, %v382_v18   ;;  %v809_v38 = vand.u32 2147483647, %v2887_v27  ;;  %v444_v5 = vmul.f32 %v2908_v28, %v2765_v63  ;;  %vm448_vm14 = vweird.f32 %v2765_v63  ;;  %vm820_vm15 = vweird.f32 %v2884_v59 }
 0x2dd   :  { %479 = vperm.xlu1 %1940, %v412_v62   ;;  %v452_v34 = vand.u32 2147483647, %v2765_v63  ;;  %v2923_v61 = vperm.slane %v2869_v46, 5  ;;  %v2926_v6 = vperm.slane %v2869_v46, 4  ;;  %v426_v9 = vsel %vm2904_vm13, %v425_v52, %v421_v4 }
 0x2de   :  { %vm805_vm9 = vweird.f32 %v2887_v27  ;;  %v811_v17 = vand.u32 2147483648, %v2887_v27  ;;  %v445_v15 = vsub.f32 1.0, %v444_v5  ;;  %vm2933_vm5 = vcmp.eq.f32.partialorder %v824_v50, 8.507059e+37 }
 0x2df   :  { %v827_v22 = vor.u32 1.1754944e-38, %v826_v13  ;;  %2032 = vrcp.f32 %v2923_v61  ;;  %v2939_v53 = vperm.slane %v2869_v46, 0  ;;  %vm2942_vm8 = vcmp.eq.f32.partialorder %v809_v38, 8.507059e+37 }
 0x2e0   :  { %v2029_v47 = vpop.eup %2028  ;;  %v446_v25 = vmul.f32 %v2908_v28, %v445_v15  ;;  %v454_v60 = vand.u32 2147483648, %v2765_v63  ;;  %v427_v51 = vmul.f32 %v426_v9, %v2539_v2  ;;  %vm449_vm2 = vweird.f32 %v2908_v28 }
 0x2e1   :  { %v2031_v12 = vpop.eup %2030  ;;  %v816_v7 = vmul.f32 %v2029_v47, %v2884_v59  ;;  %2034 = vrcp.f32 %v2926_v6  ;;  %vm2951_vm7 = vcmp.eq.f32.partialorder %v452_v34, 8.507059e+37  ;;  %v869_v30 = vand.u32 2147483647, %v2923_v61  ;;  %vm2966_vm11 = vmor %vm448_vm14, %vm449_vm2 }
 0x2e2   :  { %v801_v48 = vmul.f32 %v2031_v12, %v2887_v27  ;;  %v871_v41 = vand.u32 2147483648, %v2923_v61  ;;  %v2958_v54 = vperm.slane %v2869_v46, 7  ;;  %vm821_vm10 = vweird.f32 %v2029_v47 }
 0x2e3   :  { %v817_v11 = vsub.f32 1.0, %v816_v7  ;;  %v447_v18 = vadd.f32 %v2908_v28, %v446_v25  ;;  %2036 = vrcp.f32 %v2939_v53  ;;  %vm806_vm4 = vweird.f32 %v2031_v12  ;;  %vm822_vm6 = vmor %vm820_vm15, %vm821_vm10 }
 0x2e4   :  { %476 = vperm.xlu0 %1942, %v397_v29   ;;  %v802_v42 = vsub.f32 1.0, %v801_v48  ;;  %v812_v55 = vor.u32 1.1754944e-38, %v811_v17  ;;  %v455_v19 = vor.u32 1.1754944e-38, %v454_v60  ;;  %vm865_vm0 = vweird.f32 %v2923_v61  ;;  %vm807_vm13 = vmor %vm805_vm9, %vm806_vm4 }
 0x2e5   :  { %485 = vperm.xlu1 %1940, %v442_v16   ;;  %v818_v2 = vmul.f32 %v2029_v47, %v817_v11  ;;  %v2033_v35 = vpop.eup %2032  ;;  %v854_v24 = vand.u32 2147483647, %v2926_v6  ;;  %v2973_v14 = vperm.slane %v2869_v46, 3  ;;  %vm2978_vm3 = vcmp.eq.f32.partialorder %v869_v30, 8.507059e+37 }
 0x2e6   :  { %v803_v40 = vmul.f32 %v2031_v12, %v802_v42  ;;  %v861_v4 = vmul.f32 %v2033_v35, %v2923_v61  ;;  %v872_v63 = vor.u32 1.1754944e-38, %v871_v41  ;;  %vm850_vm12 = vweird.f32 %v2926_v6 }
 0x2e7   :  { %v819_v62 = vadd.f32 %v2029_v47, %v818_v2  ;;  %v2035_v13 = vpop.eup %2034  ;;  %v451_v59 = vsel %vm2966_vm11, %v2908_v28, %v447_v18  ;;  %v856_v38 = vand.u32 2147483648, %v2926_v6  ;;  %2038 = vrcp.f32 %v2958_v54 }
 0x2e8   :  { %v804_v16 = vadd.f32 %v2031_v12, %v803_v40  ;;  %v862_v9 = vsub.f32 1.0, %v861_v4  ;;  %v846_v17 = vmul.f32 %v2035_v13, %v2926_v6  ;;  %vm866_vm14 = vweird.f32 %v2033_v35 }
 0x2e9   :  { %v823_v52 = vsel %vm822_vm6, %v2029_v47, %v819_v62  ;;  %v2994_v47 = vpop.eup %2036  ;;  %vm2999_vm15 = vcmp.eq.f32.partialorder %v854_v24, 8.507059e+37  ;;  %v857_v10 = vor.u32 1.1754944e-38, %v856_v38  ;;  %vm790_vm9 = vweird.f32 %v2939_v53 }
 0x2ea   :  { %v828_v5 = vsel %vm2933_vm5, %v827_v22, %v823_v52  ;;  %v808_v34 = vsel %vm807_vm13, %v2031_v12, %v804_v16  ;;  %v863_v12 = vmul.f32 %v2033_v35, %v862_v9  ;;  %v847_v22 = vsub.f32 1.0, %v846_v17 }
 0x2eb   :  { %v829_v27 = vmul.f32 %v828_v5, %v2573_v43  ;;  %v813_v15 = vsel %vm2942_vm8, %v812_v55, %v808_v34  ;;  %v786_v48 = vmul.f32 %v2994_v47, %v2939_v53  ;;  %v456_v43 = vsel %vm2951_vm7, %v455_v19, %v451_v59  ;;  %vm867_vm8 = vmor %vm865_vm0, %vm866_vm14 }
 0x2ec   :  { %482 = vperm.xlu0 %1942, %v427_v51   ;;  %v1212_v7 = vpop.xlane.xlu1 %1211  ;;  %v814_v0 = vmul.f32 %v813_v15, %v2569_v26  ;;  %v864_v60 = vadd.f32 %v2033_v35, %v863_v12  ;;  %v848_v51 = vmul.f32 %v2035_v13, %v847_v22  ;;  %vm851_vm5 = vweird.f32 %v2035_v13 }
 0x2ed   :  { %v3006_v25 = vmax.f32 %v1212_v7, 1e-30  ;;  %920 = vperm.xlu2 %1941, %v829_v27   ;;  %v787_v11 = vsub.f32 1.0, %v786_v48  ;;  %v2039_v26 = vpop.eup %2038  ;;  %vm791_vm2 = vweird.f32 %v2994_v47  ;;  %v794_v42 = vand.u32 2147483647, %v2939_v53  ;;  %vm852_vm7 = vmor %vm850_vm12, %vm851_vm5 }
 0x2ee   :  { %917 = vperm.xlu1 %1940, %v814_v0   ;;  %2040 = vrcp.f32 %v2973_v14  ;;  %v868_v30 = vsel %vm867_vm8, %v2033_v35, %v864_v60  ;;  %v849_v41 = vadd.f32 %v2035_v13, %v848_v51  ;;  %v891_v18 = vmul.f32 %v2039_v26, %v2958_v54  ;;  %vm3038_vm10 = vmor %vm790_vm9, %vm791_vm2 }
 0x2ef   :  { %v3017_v56 = vperm.slane %v3006_v25, 0  ;;  %v788_v2 = vmul.f32 %v2994_v47, %v787_v11  ;;  %v457_v40 = vmul.f32 %v456_v43, %v2553_v31  ;;  %v873_v61 = vsel %vm2978_vm3, %v872_v63, %v868_v30 }
 0x2f0   :  { %v796_v55 = vand.u32 2147483648, %v2939_v53  ;;  %v853_v19 = vsel %vm852_vm7, %v2035_v13, %v849_v41  ;;  %v892_v62 = vsub.f32 1.0, %v891_v18  ;;  %v899_v29 = vand.u32 2147483647, %v2958_v54 }
 0x2f1   :  { %2042 = vrcp.f32 %v3017_v56  ;;  %v789_v35 = vadd.f32 %v2994_v47, %v788_v2  ;;  %v874_v24 = vmul.f32 %v873_v61, %v2595_v23  ;;  %v858_v31 = vsel %vm2999_vm15, %v857_v10, %v853_v19 }
 0x2f2   :  { %v901_v16 = vand.u32 2147483648, %v2958_v54  ;;  %v859_v4 = vmul.f32 %v858_v31, %v2564_v39  ;;  %v893_v50 = vmul.f32 %v2039_v26, %v892_v62  ;;  %vm896_vm4 = vweird.f32 %v2039_v26 }
 0x2f3   :  { %v793_v23 = vsel %vm3038_vm10, %v2994_v47, %v789_v35  ;;  %vm795_vm11 = vcmp.eq.f32.partialorder %v794_v42, 8.507059e+37  ;;  %v797_v13 = vor.u32 1.1754944e-38, %v796_v55  ;;  %vm895_vm0 = vweird.f32 %v2958_v54 }
 0x2f4   :  { %488 = vperm.xlu0 %1942, %v457_v40   ;;  %v2041_v63 = vpop.eup %2040  ;;  %v3049_v53 = vperm.slane %v2869_v46, 6  ;;  %v894_v52 = vadd.f32 %v2039_v26, %v893_v50  ;;  %vm900_vm6 = vcmp.eq.f32.partialorder %v899_v29, 8.507059e+37  ;;  %vm835_vm3 = vweird.f32 %v2973_v14  ;;  %vm897_vm12 = vmor %vm895_vm0, %vm896_vm4 }
 0x2f5   :  { %929 = vperm.xlu2 %1941, %v874_v24   ;;  %v831_v39 = vmul.f32 %v2041_v63, %v2973_v14  ;;  %v798_v38 = vsel %vm795_vm11, %v797_v13, %v793_v23  ;;  %v902_v5 = vor.u32 1.1754944e-38, %v901_v16  ;;  %v3054_v34 = vperm.slane %v3006_v25, 2 }
 0x2f6   :  { %926 = vperm.xlu1 %1940, %v859_v4   ;;  %v3057_v9 = vperm.slane %v3006_v25, 3  ;;  %v898_v54 = vsel %vm897_vm12, %v2039_v26, %v894_v52  ;;  %v1240_v17 = vand.u32 2147483647, %v3017_v56  ;;  %v839_v15 = vand.u32 2147483647, %v2973_v14 }
 0x2f7   :  { %v2043_v59 = vpop.eup %2042  ;;  %v832_v47 = vsub.f32 1.0, %v831_v39  ;;  %v903_v27 = vsel %vm900_vm6, %v902_v5, %v898_v54  ;;  %v841_v28 = vand.u32 2147483648, %v2973_v14  ;;  %2044 = vrcp.f32 %v3054_v34 }
 0x2f8   :  { %v1232_v46 = vmul.f32 %v2043_v59, %v3017_v56  ;;  %v799_v7 = vmul.f32 %v798_v38, %v2549_v33  ;;  %vm836_vm13 = vweird.f32 %v2041_v63  ;;  %vm1236_vm14 = vweird.f32 %v3017_v56 }
 0x2f9   :  { %v833_v12 = vmul.f32 %v2041_v63, %v832_v47  ;;  %vm1237_vm15 = vweird.f32 %v2043_v59  ;;  %v1242_v22 = vand.u32 2147483648, %v3017_v56  ;;  %2046 = vrcp.f32 %v3057_v9  ;;  %vm837_vm5 = vmor %vm835_vm3, %vm836_vm13 }
 0x2fa   :  { %v1233_v0 = vsub.f32 1.0, %v1232_v46  ;;  %v904_v48 = vmul.f32 %v903_v27, %v2586_v8  ;;  %v1270_v60 = vand.u32 2147483647, %v3054_v34  ;;  %vm3070_vm9 = vcmp.eq.f32.partialorder %v1240_v17, 8.507059e+37  ;;  %vm1238_vm2 = vmor %vm1236_vm14, %vm1237_vm15 }
 0x2fb   :  { %v834_v10 = vadd.f32 %v2041_v63, %v833_v12  ;;  %v842_v33 = vor.u32 1.1754944e-38, %v841_v28  ;;  %v1272_v11 = vand.u32 2147483648, %v3054_v34  ;;  %2048 = vrcp.f32 %v3049_v53 }
 0x2fc   :  { %914 = vperm.xlu0 %1942, %v799_v7   ;;  %v1234_v43 = vmul.f32 %v2043_v59, %v1233_v0  ;;  %vm840_vm8 = vcmp.eq.f32.partialorder %v839_v15, 8.507059e+37  ;;  %v1285_v8 = vand.u32 2147483647, %v3057_v9  ;;  %v1243_v41 = vor.u32 1.1754944e-38, %v1242_v22 }
 0x2fd   :  { %v838_v42 = vsel %vm837_vm5, %v2041_v63, %v834_v10  ;;  %v2045_v30 = vpop.eup %2044  ;;  %vm1266_vm7 = vweird.f32 %v3054_v34  ;;  %v3084_v14 = vperm.slane %v3006_v25, 5  ;;  %vm3087_vm10 = vcmp.eq.f32.partialorder %v1270_v60, 8.507059e+37 }
 0x2fe   :  { %935 = vperm.xlu1 %1940, %v904_v48   ;;  %v1235_v26 = vadd.f32 %v2043_v59, %v1234_v43  ;;  %v843_v2 = vsel %vm840_vm8, %v842_v33, %v838_v42  ;;  %v1262_v40 = vmul.f32 %v2045_v30, %v3054_v34  ;;  %vm1281_vm4 = vweird.f32 %v3057_v9  ;;  %v1658_v62 = vpop.xlane.xlu2 %1657 }
 0x2ff   :  { %v2047_v55 = vpop.eup %2046  ;;  %v1273_v19 = vor.u32 1.1754944e-38, %v1272_v11  ;;  %v1287_v35 = vand.u32 2147483648, %v3057_v9  ;;  %2050 = vrcp.f32 %v3084_v14  ;;  %v844_v24 = vmul.f32 %v843_v2, %v2590_v45 }
 0x300   :  { %v1239_v18 = vsel %vm1238_vm2, %v2043_v59, %v1235_v26  ;;  %v1263_v31 = vsub.f32 1.0, %v1262_v40  ;;  %v1277_v6 = vmul.f32 %v2047_v55, %v3057_v9  ;;  %vm3099_vm11 = vcmp.eq.f32.partialorder %v1285_v8, 8.507059e+37 }
 0x301   :  { %v1244_v56 = vsel %vm3070_vm9, %v1243_v41, %v1239_v18  ;;  %v2049_v4 = vpop.eup %2048  ;;  %vm880_vm0 = vweird.f32 %v3049_v53  ;;  %v884_v23 = vand.u32 2147483647, %v3049_v53  ;;  %v3106_v50 = vperm.slane %v3006_v25, 6 }
 0x302   :  { %v1245_v29 = vmul.f32 %v1244_v56, %v2611_v37  ;;  %v3109_v63 = vperm.slane %v3006_v25, 1  ;;  %v1264_v45 = vmul.f32 %v2045_v30, %v1263_v31  ;;  %vm1267_vm6 = vweird.f32 %v2045_v30 }
 0x303   :  { %v1278_v37 = vsub.f32 1.0, %v1277_v6  ;;  %v876_v13 = vmul.f32 %v2049_v4, %v3049_v53  ;;  %v3112_v52 = vmax.f32 %v1658_v62, 1e-30  ;;  %v1288_v39 = vor.u32 1.1754944e-38, %v1287_v35  ;;  %vm1268_vm12 = vmor %vm1266_vm7, %vm1267_vm6 }
 0x304   :  { %1360 = vperm.xlu2 %1941, %v1245_v29   ;;  %923 = vperm.xlu0 %1942, %v844_v24   ;;  %v886_v59 = vand.u32 2147483648, %v3049_v53  ;;  %2052 = vrcp.f32 %v3106_v50  ;;  %v1265_v38 = vadd.f32 %v2045_v30, %v1264_v45  ;;  %vm1282_vm3 = vweird.f32 %v2047_v55 }
 0x305   :  { %v1279_v5 = vmul.f32 %v2047_v55, %v1278_v37  ;;  %v877_v54 = vsub.f32 1.0, %v876_v13  ;;  %v2051_v46 = vpop.eup %2050  ;;  %vm881_vm13 = vweird.f32 %v2049_v4  ;;  %vm3118_vm14 = vcmp.eq.f32.partialorder %v884_v23, 8.507059e+37  ;;  %vm1283_vm15 = vmor %vm1281_vm4, %vm1282_vm3 }
 0x306   :  { %v1315_v47 = vand.u32 2147483647, %v3084_v14  ;;  %2054 = vrcp.f32 %v3109_v63  ;;  %v1269_v27 = vsel %vm1268_vm12, %v2045_v30, %v1265_v38  ;;  %v1307_v7 = vmul.f32 %v2051_v46, %v3084_v14  ;;  %vm882_vm5 = vmor %vm880_vm0, %vm881_vm13 }
 0x307   :  { %v1280_v15 = vadd.f32 %v2047_v55, %v1279_v5  ;;  %v878_v28 = vmul.f32 %v2049_v4, %v877_v54  ;;  %v1274_v0 = vsel %vm3087_vm10, %v1273_v19, %v1269_v27  ;;  %v887_v34 = vor.u32 1.1754944e-38, %v886_v59 }
 0x308   :  { %vm1311_vm9 = vweird.f32 %v3084_v14  ;;  %v1317_v12 = vand.u32 2147483648, %v3084_v14  ;;  %v1275_v22 = vmul.f32 %v1274_v0, %v2602_v58  ;;  %v1308_v10 = vsub.f32 1.0, %v1307_v7 }
 0x309   :  { %v1284_v48 = vsel %vm1283_vm15, %v2047_v55, %v1280_v15  ;;  %v879_v43 = vadd.f32 %v2049_v4, %v878_v28  ;;  %vm1312_vm8 = vweird.f32 %v2051_v46  ;;  %vm3137_vm2 = vcmp.eq.f32.partialorder %v1315_v47, 8.507059e+37 }
 0x30a   :  { %v2053_v60 = vpop.eup %2052  ;;  %v1289_v51 = vsel %vm3099_vm11, %v1288_v39, %v1284_v48  ;;  %v3142_v33 = vperm.slane %v3112_v52, 0  ;;  %1366 = vperm.xlu1 %1940, %v1275_v22   ;;  %v1309_v26 = vmul.f32 %v2051_v46, %v1308_v10  ;;  %v1318_v30 = vor.u32 1.1754944e-38, %v1317_v12  ;;  %vm1313_vm10 = vmor %vm1311_vm9, %vm1312_vm8 }
 0x30b   :  { %v1290_v58 = vmul.f32 %v1289_v51, %v2628_v36  ;;  %v883_v11 = vsel %vm882_vm5, %v2049_v4, %v879_v43  ;;  %v1322_v42 = vmul.f32 %v2053_v60, %v3106_v50  ;;  %vm1326_vm7 = vweird.f32 %v3106_v50 }
 0x30c   :  { %v2055_v8 = vpop.eup %2054  ;;  %v888_v53 = vsel %vm3118_vm14, %v887_v34, %v883_v11  ;;  %2056 = vrcp.f32 %v3142_v33  ;;  %v1310_v2 = vadd.f32 %v2051_v46, %v1309_v26  ;;  %vm1327_vm4 = vweird.f32 %v2053_v60 }
 0x30d   :  { %1369 = vperm.xlu2 %1941, %v1290_v58   ;;  %v889_v41 = vmul.f32 %v888_v53, %v2606_v32  ;;  %v1323_v18 = vsub.f32 1.0, %v1322_v42  ;;  %v1247_v36 = vmul.f32 %v2055_v8, %v3109_v63  ;;  %v1330_v40 = vand.u32 2147483647, %v3106_v50  ;;  %vm1328_vm0 = vmor %vm1326_vm7, %vm1327_vm4 }
 0x30e   :  { %v1332_v61 = vand.u32 2147483648, %v3106_v50  ;;  %v1255_v55 = vand.u32 2147483647, %v3109_v63  ;;  %v1314_v56 = vsel %vm1313_vm10, %v2051_v46, %v1310_v2  ;;  %v3159_v32 = vperm.slane %v3112_v52, 1 }
 0x30f   :  { %932 = vperm.xlu0 %1942, %v889_v41   ;;  %v1324_v19 = vmul.f32 %v2053_v60, %v1323_v18  ;;  %v1248_v35 = vsub.f32 1.0, %v1247_v36  ;;  %v1319_v62 = vsel %vm3137_vm2, %v1318_v30, %v1314_v56  ;;  %vm1252_vm11 = vweird.f32 %v2055_v8 }
 0x310   :  { %v1257_v14 = vand.u32 2147483648, %v3109_v63  ;;  %v3165_v29 = vperm.slane %v3006_v25, 4  ;;  %v1320_v24 = vmul.f32 %v1319_v62, %v2619_v57  ;;  %2058 = vrcp.f32 %v3159_v32 }
 0x311   :  { %v1325_v31 = vadd.f32 %v2053_v60, %v1324_v19  ;;  %v1249_v6 = vmul.f32 %v2055_v8, %v1248_v35  ;;  %v1333_v4 = vor.u32 1.1754944e-38, %v1332_v61  ;;  %vm1251_vm6 = vweird.f32 %v3109_v63 }
 0x312   :  { %v2057_v16 = vpop.eup %2056  ;;  %2060 = vrcp.f32 %v3165_v29  ;;  %1375 = vperm.xlu1 %1940, %v1320_v24   ;;  %vm1331_vm3 = vcmp.eq.f32.partialorder %v1330_v40, 8.507059e+37  ;;  %vm1253_vm12 = vmor %vm1251_vm6, %vm1252_vm11  ;;  %vm1256_vm13 = vcmp.eq.f32.partialorder %v1255_v55, 8.507059e+37  ;;  %v1258_v13 = vor.u32 1.1754944e-38, %v1257_v14 }
 0x313   :  { %v1329_v23 = vsel %vm1328_vm0, %v2053_v60, %v1325_v31  ;;  %v1250_v45 = vadd.f32 %v2055_v8, %v1249_v6  ;;  %v1678_v57 = vmul.f32 %v2057_v16, %v3142_v33  ;;  %v1686_v39 = vand.u32 2147483647, %v3142_v33 }
 0x314   :  { %v1334_v37 = vsel %vm1331_vm3, %v1333_v4, %v1329_v23  ;;  %v1688_v63 = vand.u32 2147483648, %v3142_v33  ;;  %v3180_v54 = vperm.slane %v3112_v52, 3  ;;  %v3183_v46 = vperm.slane %v3112_v52, 4 }
 0x315   :  { %v1335_v50 = vmul.f32 %v1334_v37, %v2642_v20  ;;  %v1254_v59 = vsel %vm1253_vm12, %v2055_v8, %v1250_v45  ;;  %v1679_v38 = vsub.f32 1.0, %v1678_v57  ;;  %vm1682_vm14 = vweird.f32 %v3142_v33 }
 0x316   :  { %v1259_v5 = vsel %vm1256_vm13, %v1258_v13, %v1254_v59  ;;  %v2059_v17 = vpop.eup %2058  ;;  %vm1683_vm15 = vweird.f32 %v2057_v16  ;;  %vm3187_vm9 = vcmp.eq.f32.partialorder %v1686_v39, 8.507059e+37  ;;  %v1701_v7 = vand.u32 2147483647, %v3159_v32 }
 0x317   :  { %1378 = vperm.xlu2 %1941, %v1335_v50   ;;  %v1260_v47 = vmul.f32 %v1259_v5, %v2623_v1  ;;  %v1680_v27 = vmul.f32 %v2057_v16, %v1679_v38  ;;  %v1693_v28 = vmul.f32 %v2059_v17, %v3159_v32  ;;  %2062 = vrcp.f32 %v3180_v54  ;;  %vm1684_vm5 = vmor %vm1682_vm14, %vm1683_vm15 }
 0x318   :  { %v2061_v20 = vpop.eup %2060  ;;  %v1689_v34 = vor.u32 1.1754944e-38, %v1688_v63  ;;  %v1703_v1 = vand.u32 2147483648, %v3159_v32  ;;  %v1300_v48 = vand.u32 2147483647, %v3165_v29  ;;  %2064 = vrcp.f32 %v3183_v46 }
 0x319   :  { %1363 = vperm.xlu0 %1942, %v1260_v47   ;;  %v1681_v0 = vadd.f32 %v2057_v16, %v1680_v27  ;;  %v1292_v12 = vmul.f32 %v2061_v20, %v3165_v29  ;;  %v1694_v22 = vsub.f32 1.0, %v1693_v28  ;;  %v3199_v43 = vperm.slane %v3006_v25, 7 }
 0x31a   :  { %vm1697_vm8 = vweird.f32 %v3159_v32  ;;  %v1302_v51 = vand.u32 2147483648, %v3165_v29  ;;  %vm1698_vm2 = vweird.f32 %v2059_v17  ;;  %vm3205_vm7 = vcmp.eq.f32.partialorder %v1701_v7, 8.507059e+37  ;;  %v3523_v7 = vld [vmem:[#allocation13_spill] sm:$0xff] }
 0x31b   :  { %v1685_v10 = vsel %vm1684_vm5, %v2057_v16, %v1681_v0  ;;  %v1293_v60 = vsub.f32 1.0, %v1292_v12  ;;  %v1695_v33 = vmul.f32 %v2059_v17, %v1694_v22  ;;  %v1704_v26 = vor.u32 1.1754944e-38, %v1703_v1  ;;  %vm1699_vm0 = vmor %vm1697_vm8, %vm1698_vm2 }
 0x31c   :  { %v1690_v9 = vsel %vm3187_vm9, %v1689_v34, %v1685_v10  ;;  %vm1297_vm10 = vweird.f32 %v2061_v20  ;;  %vm1296_vm4 = vweird.f32 %v3165_v29  ;;  %vm3211_vm11 = vcmp.eq.f32.partialorder %v1300_v48, 8.507059e+37 }
 0x31d   :  { %v1691_v11 = vmul.f32 %v1690_v9, %v2635_v21  ;;  %v1294_v25 = vmul.f32 %v2061_v20, %v1293_v60  ;;  %v2063_v42 = vpop.eup %2062  ;;  %v1696_v8 = vadd.f32 %v2059_v17, %v1695_v33  ;;  %2066 = vrcp.f32 %v3199_v43  ;;  %vm1298_vm6 = vmor %vm1296_vm4, %vm1297_vm10 }
 0x31e   :  { %v1303_v41 = vor.u32 1.1754944e-38, %v1302_v51  ;;  %v1723_v21 = vmul.f32 %v2063_v42, %v3180_v54  ;;  %v1731_v2 = vand.u32 2147483647, %v3180_v54  ;;  %v2065_v18 = vpop.eup %2064  ;;  %v1733_v40 = vand.u32 2147483648, %v3180_v54  ;;  %v3524_v51 = vld [vmem:[#allocation10_spill] sm:$0xff] }
 0x31f   :  { %1806 = vperm.xlu1 %1940, %v1691_v11   ;;  %v1295_v30 = vadd.f32 %v2061_v20, %v1294_v25  ;;  %v1700_v36 = vsel %vm1699_vm0, %v2059_v17, %v1696_v8  ;;  %v1746_v61 = vand.u32 2147483647, %v3183_v46  ;;  %v3223_v55 = vperm.slane %v3112_v52, 6 }
 0x320   :  { %v1705_v56 = vsel %vm3205_vm7, %v1704_v26, %v1700_v36  ;;  %v1724_v35 = vsub.f32 1.0, %v1723_v21  ;;  %v1738_v32 = vmul.f32 %v2065_v18, %v3183_v46  ;;  %vm1728_vm3 = vweird.f32 %v2063_v42  ;;  %v3525_v36 = vld [vmem:[#allocation11_spill] sm:$0xff] }
 0x321   :  { %v1299_v19 = vsel %vm1298_vm6, %v2061_v20, %v1295_v30  ;;  %v1706_v62 = vmul.f32 %v1705_v56, %v2656_v3  ;;  %v1748_v29 = vand.u32 2147483648, %v3183_v46  ;;  %2068 = vrcp.f32 %v3223_v55 }
 0x322   :  { %v1304_v14 = vsel %vm3211_vm11, %v1303_v41, %v1299_v19  ;;  %v1725_v31 = vmul.f32 %v2063_v42, %v1724_v35  ;;  %v1739_v6 = vsub.f32 1.0, %v1738_v32  ;;  %vm1727_vm12 = vweird.f32 %v3180_v54 }
 0x323   :  { %v1305_v24 = vmul.f32 %v1304_v14, %v2638_v49  ;;  %v2067_v16 = vpop.eup %2066  ;;  %1809 = vperm.xlu2 %1941, %v1706_v62   ;;  %vm3235_vm13 = vcmp.eq.f32.partialorder %v1731_v2, 8.507059e+37  ;;  %vm1742_vm14 = vweird.f32 %v3183_v46  ;;  %v3241_v3 = vperm.slane %v3112_v52, 7  ;;  %vm1729_vm9 = vmor %vm1727_vm12, %vm1728_vm3 }
 0x324   :  { %v1726_v23 = vadd.f32 %v2063_v42, %v1725_v31  ;;  %v1740_v49 = vmul.f32 %v2065_v18, %v1739_v6  ;;  %vm1743_vm15 = vweird.f32 %v2065_v18  ;;  %v1337_v45 = vmul.f32 %v2067_v16, %v3199_v43 }
 0x325   :  { %1372 = vperm.xlu0 %1942, %v1305_v24   ;;  %v1734_v57 = vor.u32 1.1754944e-38, %v1733_v40  ;;  %vm3245_vm5 = vcmp.eq.f32.partialorder %v1746_v61, 8.507059e+37  ;;  %v1345_v13 = vand.u32 2147483647, %v3199_v43  ;;  %2070 = vrcp.f32 %v3241_v3  ;;  %vm1744_vm8 = vmor %vm1742_vm14, %vm1743_vm15 }
 0x326   :  { %v1730_v39 = vsel %vm1729_vm9, %v2063_v42, %v1726_v23  ;;  %v1741_v50 = vadd.f32 %v2065_v18, %v1740_v49  ;;  %v1749_v59 = vor.u32 1.1754944e-38, %v1748_v29  ;;  %v1338_v38 = vsub.f32 1.0, %v1337_v45  ;;  %v3526_v29 = vld [vmem:[#allocation15_spill] sm:$0xff]  ;;  %v3527_v45 = vld [vmem:[#allocation12_spill] sm:$0xff] }
 0x327   :  { %v1735_v63 = vsel %vm3235_vm13, %v1734_v57, %v1730_v39  ;;  %v1347_v5 = vand.u32 2147483648, %v3199_v43  ;;  %v3257_v54 = vperm.slane %v3112_v52, 2  ;;  %v3260_v17 = vperm.slane %v3112_v52, 5  ;;  %v2069_v47 = vpop.eup %2068 }
 0x328   :  { %v1736_v27 = vmul.f32 %v1735_v63, %v2649_v44  ;;  %v1745_v20 = vsel %vm1744_vm8, %v2065_v18, %v1741_v50  ;;  %v1339_v15 = vmul.f32 %v2067_v16, %v1338_v38  ;;  %vm1342_vm2 = vweird.f32 %v2067_v16 }
 0x329   :  { %v1750_v28 = vsel %vm3245_vm5, %v1749_v59, %v1745_v20  ;;  %v1768_v46 = vmul.f32 %v2069_v47, %v3223_v55  ;;  %vm1341_vm7 = vweird.f32 %v3199_v43  ;;  %2072 = vrcp.f32 %v3257_v54  ;;  %v3528_v59 = vld [vmem:[#allocation14_spill] sm:$0xff]  ;;  %v3529_v20 = vld [vmem:[#allocation9_spill] sm:$0xff] }
 0x32a   :  { %1815 = vperm.xlu1 %1940, %v1736_v27   ;;  %v1751_v0 = vmul.f32 %v1750_v28, %v3523_v7  ;;  %v1340_v34 = vadd.f32 %v2067_v16, %v1339_v15  ;;  %vm1343_vm10 = vmor %vm1341_vm7, %vm1342_vm2  ;;  %v1348_v1 = vor.u32 1.1754944e-38, %v1347_v5  ;;  %2074 = vrcp.f32 %v3260_v17 }
 0x32b   :  { %v2071_v52 = vpop.eup %2070  ;;  %v1769_v44 = vsub.f32 1.0, %v1768_v46  ;;  %vm1346_vm4 = vcmp.eq.f32.partialorder %v1345_v13, 8.507059e+37  ;;  %v1778_v22 = vand.u32 2147483648, %v3223_v55  ;;  %vm1773_vm11 = vweird.f32 %v2069_v47 }
 0x32c   :  { %1818 = vperm.xlu2 %1941, %v1751_v0   ;;  %v1344_v12 = vsel %vm1343_vm10, %v2067_v16, %v1340_v34  ;;  %v1783_v48 = vmul.f32 %v2071_v52, %v3241_v3  ;;  %v1776_v43 = vand.u32 2147483647, %v3223_v55  ;;  %vm1772_vm0 = vweird.f32 %v3223_v55 }
 0x32d   :  { %v1349_v10 = vsel %vm1346_vm4, %v1348_v1, %v1344_v12  ;;  %v1770_v60 = vmul.f32 %v2069_v47, %v1769_v44  ;;  %v1793_v11 = vand.u32 2147483648, %v3241_v3  ;;  %vm1774_vm6 = vmor %vm1772_vm0, %vm1773_vm11  ;;  %v1779_v25 = vor.u32 1.1754944e-38, %v1778_v22 }
 0x32e   :  { %v1350_v9 = vmul.f32 %v1349_v10, %v3524_v51  ;;  %v1784_v33 = vsub.f32 1.0, %v1783_v48  ;;  %vm1788_vm3 = vweird.f32 %v2071_v52  ;;  %v1791_v8 = vand.u32 2147483647, %v3241_v3 }
 0x32f   :  { %v1771_v58 = vadd.f32 %v2069_v47, %v1770_v60  ;;  %v2073_v26 = vpop.eup %2072  ;;  %vm1777_vm12 = vcmp.eq.f32.partialorder %v1776_v43, 8.507059e+37  ;;  %vm1787_vm13 = vweird.f32 %v3241_v3  ;;  %v1794_v61 = vor.u32 1.1754944e-38, %v1793_v11 }
 0x330   :  { %1381 = vperm.xlu0 %1942, %v1350_v9   ;;  %v1785_v42 = vmul.f32 %v2071_v52, %v1784_v33  ;;  %v2075_v53 = vpop.eup %2074  ;;  %v1708_v41 = vmul.f32 %v2073_v26, %v3257_v54  ;;  %vm1789_vm14 = vmor %vm1787_vm13, %vm1788_vm3  ;;  %vm1792_vm15 = vcmp.eq.f32.partialorder %v1791_v8, 8.507059e+37  ;;  %v1718_v19 = vand.u32 2147483648, %v3257_v54  ;;  %v2092_v33 = vld [vmem:[%s3439_s1] sm:$0xff] }
 0x331   :  { %v1775_v30 = vsel %vm1774_vm6, %v2069_v47, %v1771_v58  ;;  %v1753_v18 = vmul.f32 %v2075_v53, %v3260_v17  ;;  %vm1713_vm9 = vweird.f32 %v2073_v26  ;;  %v1716_v14 = vand.u32 2147483647, %v3257_v54 }
 0x332   :  { %v1780_v21 = vsel %vm1777_vm12, %v1779_v25, %v1775_v30  ;;  %v1786_v2 = vadd.f32 %v2071_v52, %v1785_v42  ;;  %v1709_v55 = vsub.f32 1.0, %v1708_v41  ;;  %vm1712_vm5 = vweird.f32 %v3257_v54 }
 0x333   :  { %v1781_v40 = vmul.f32 %v1780_v21, %v3525_v36  ;;  %v1754_v35 = vsub.f32 1.0, %v1753_v18  ;;  %vm1714_vm8 = vmor %vm1712_vm5, %vm1713_vm9  ;;  %v1719_v16 = vor.u32 1.1754944e-38, %v1718_v19  ;;  %vm1717_vm2 = vcmp.eq.f32.partialorder %v1716_v14, 8.507059e+37 }
 0x334   :  { %v1790_v56 = vsel %vm1789_vm14, %v2071_v52, %v1786_v2  ;;  %v1710_v62 = vmul.f32 %v2073_v26, %v1709_v55  ;;  %vm1758_vm7 = vweird.f32 %v2075_v53  ;;  %v1763_v49 = vand.u32 2147483648, %v3260_v17 }
 0x335   :  { %1824 = vperm.xlu1 %1940, %v1781_v40   ;;  %v1795_v32 = vsel %vm1792_vm15, %v1794_v61, %v1790_v56  ;;  %v1755_v31 = vmul.f32 %v2075_v53, %v1754_v35  ;;  %vm1757_vm10 = vweird.f32 %v3260_v17  ;;  %v1761_v37 = vand.u32 2147483647, %v3260_v17 }
 0x336   :  { %v1796_v24 = vmul.f32 %v1795_v32, %v3526_v29  ;;  %v1711_v6 = vadd.f32 %v2073_v26, %v1710_v62  ;;  %vm1759_vm4 = vmor %vm1757_vm10, %vm1758_vm7  ;;  %v1764_v39 = vor.u32 1.1754944e-38, %v1763_v49  ;;  %vm3530_vm0 = vcmask 1042434  }
 0x337   :  { %v1756_v3 = vadd.f32 %v2075_v53, %v1755_v31  ;;  %vm1762_vm11 = vcmp.eq.f32.partialorder %v1761_v37, 8.507059e+37  ;;  %vm3531_vm6 = vcmask 1043459   ;;  %vm3532_vm3 = vcmask 1044484   ;;  %vm3537_vm9 = vmmov %vm3530_vm0 }
 0x338   :  { %1827 = vperm.xlu2 %1941, %v1796_v24   ;;  %v1715_v4 = vsel %vm1714_vm8, %v2073_v26, %v1711_v6  ;;  %vm3533_vm12 = vcmask 1045509   ;;  %vm3534_vm13 = vcmask 1046534   ;;  %vm3535_vm14 = vcmask 1047559   ;;  %vm3538_vm5 = vmmov %vm3531_vm6 }
 0x339   :  { %v1720_v23 = vsel %vm1717_vm2, %v1719_v16, %v1715_v4  ;;  %v1760_v13 = vsel %vm1759_vm4, %v2075_v53, %v1756_v3  ;;  %vm3536_vm15 = vcmask 64512   ;;  %vm3539_vm8 = vmmov %vm3532_vm3 }
 0x33a   :  { %v1721_v57 = vmul.f32 %v1720_v23, %v3527_v45  ;;  %v1765_v50 = vsel %vm1762_vm11, %v1764_v39, %v1760_v13  ;;  %vm3540_vm2 = vmmov %vm3533_vm12 }
 0x33b   :  { %v1766_v38 = vmul.f32 %v1765_v50, %v3528_v59  ;;  %vm3541_vm7 = vmmov %vm3534_vm13 }
 0x33c   :  { %1812 = vperm.xlu0 %1942, %v1721_v57   ;;  %vm3542_vm10 = vmmov %vm3535_vm14 }
 0x33d   :  { %vm3543_vm4 = vmmov %vm3536_vm15 }
 0x33e   :  { %vm3544_vm11 = vmmov %vm3530_vm0 }
 0x344   :  { %1821 = vperm.xlu0 %1942, %v1766_v38   ;;  %v3336_v38 = vld [vmem:[%s3442_s4 + $0x38] sm:$0xff] }
 0x345   :  { %542 = vmatpush.msra.mxu1 %v3336_v38  ;;  %987 = vmatpush.msra.mxu3 %v3336_v38 }
 0x346   :  { %v471_v63 = vpop.permute.xlu0 %470  ;;  %1433 = vmatpush.msrb.mxu2 %v3336_v38 }
 0x347   :  { %v468_v54 = vpop.permute.xlu1 %467  ;;  %v491_v28 = vperm.slane %v471_v63, %v3529_v20  ;;  %v921_v26 = vpop.permute.xlu2 %920  ;;  %v3341_v63 = vld [vmem:[%s3442_s4 + $0x30] sm:$0xff] }
 0x348   :  { %v490_v15 = vperm.slane %v468_v54, %v3529_v20  ;;  %v939_v21 = vperm.slane %v921_v26, %v3529_v20  ;;  %543 = vmatpush.msra.mxu1 %v3341_v63  ;;  %988 = vmatpush.msra.mxu3 %v3341_v63 }
 0x349   :  { %1434 = vmatpush.msrb.mxu2 %v3341_v63 }
 0x34a   :  { %v498_v0 = vsel %vm201_vm1, %v491_v28, %v490_v15  ;;  %v84_v15 = vld [vmem:[%s3442_s4 + $0x20] sm:$0xff] }
 0x34e   :  { %v474_v5 = vpop.permute.xlu0 %473 }
 0x34f   :  { %v480_v27 = vpop.permute.xlu1 %479  ;;  %v492_v17 = vperm.slane %v474_v5, %v3529_v20  ;;  %v930_v36 = vpop.permute.xlu2 %929 }
 0x350   :  { %v494_v44 = vperm.slane %v480_v27, %v3529_v20  ;;  %v942_v56 = vperm.slane %v930_v36, %v3529_v20 }
 0x351   :  { %v499_v34 = vsel %vm3530_vm0, %v492_v17, %v498_v0  ;;  %vm3545_vm0 = vmmov %vm3538_vm5 }
 0x356   :  { %v477_v47 = vpop.permute.xlu0 %476 }
 0x357   :  { %v493_v46 = vperm.slane %v477_v47, %v3529_v20  ;;  %v486_v12 = vpop.permute.xlu1 %485  ;;  %v85_v47 = vld [vmem:[%s3442_s4 + $0x28] sm:$0xff] }
 0x358   :  { %v496_v10 = vperm.slane %v486_v12, %v3529_v20  ;;  %544 = vmatpush.msra.mxu1 %v85_v47  ;;  %989 = vmatpush.msra.mxu3 %v85_v47  ;;  %v81_v12 = vld [vmem:[%s3442_s4 + $0x8] sm:$0xff] }
 0x359   :  { %v500_v52 = vsel %vm3531_vm6, %v493_v46, %v499_v34  ;;  %vm3546_vm6 = vmmov %vm3532_vm3  ;;  %v83_v34 = vld [vmem:[%s3442_s4 + $0x18] sm:$0xff]  ;;  %1435 = vmatpush.msrb.mxu2 %v85_v47 }
 0x35a   :  { %v501_v22 = vsel %vm3532_vm3, %v494_v44, %v500_v52  ;;  %vm3547_vm3 = vmmov %vm3540_vm2  ;;  %545 = vmatpush.msra.mxu1 %v84_v15  ;;  %990 = vmatpush.msra.mxu3 %v84_v15  ;;  %v82_v44 = vld [vmem:[%s3442_s4 + $0x10] sm:$0xff] }
 0x35b   :  { %1436 = vmatpush.msrb.mxu2 %v84_v15 }
 0x35c   :  { %546 = vmatpush.msra.mxu1 %v83_v34  ;;  %991 = vmatpush.msra.mxu3 %v83_v34 }
 0x35d   :  { %1437 = vmatpush.msrb.mxu2 %v83_v34 }
 0x35e   :  { %v483_v7 = vpop.permute.xlu0 %482  ;;  %v1361_v24 = vpop.permute.xlu2 %1360  ;;  %547 = vmatpush.msra.mxu1 %v82_v44  ;;  %992 = vmatpush.msra.mxu3 %v82_v44 }
 0x35f   :  { %v495_v1 = vperm.slane %v483_v7, %v3529_v20  ;;  %v1383_v3 = vperm.slane %v1361_v24, %v3529_v20  ;;  %1438 = vmatpush.msrb.mxu2 %v82_v44 }
 0x360   :  { %v918_v58 = vpop.permute.xlu1 %917  ;;  %548 = vmatpush.msra.mxu1 %v81_v12  ;;  %993 = vmatpush.msra.mxu3 %v81_v12 }
 0x361   :  { %v502_v48 = vsel %vm3533_vm12, %v495_v1, %v501_v22  ;;  %v938_v53 = vperm.slane %v918_v58, %v3529_v20  ;;  %vm3548_vm12 = vmmov %vm3541_vm7  ;;  %1439 = vmatpush.msrb.mxu2 %v81_v12 }
 0x362   :  { %v503_v51 = vsel %vm3534_vm13, %v496_v10, %v502_v48  ;;  %vm3549_vm13 = vmmov %vm3542_vm10 }
 0x366   :  { %v489_v60 = vpop.permute.xlu0 %488 }
 0x367   :  { %v497_v43 = vperm.slane %v489_v60, %v3529_v20  ;;  %v1370_v16 = vpop.permute.xlu2 %1369 }
 0x368   :  { %v927_v42 = vpop.permute.xlu1 %926  ;;  %v1386_v50 = vperm.slane %v1370_v16, %v3529_v20 }
 0x369   :  { %v504_v9 = vsel %vm3535_vm14, %v497_v43, %v503_v51  ;;  %v941_v40 = vperm.slane %v927_v42, %v3529_v20  ;;  %vm3550_vm14 = vmmov %vm3543_vm4 }
 0x36a   :  { %1923 = vmatmul.msk.f32.vlgmr.msra.gmra.mxu0 %vm3536_vm15, %v504_v9  ;;  %vm3551_vm15 = vmmov %vm3537_vm9 }
 0x36b   :  { %1861 = vmatpush.msra.mxu0 %v2092_v33 }
 0x36e   :  { %v915_v11 = vpop.permute.xlu0 %914 }
 0x36f   :  { %v937_v25 = vperm.slane %v915_v11, %v3529_v20 }
 0x370   :  { %v936_v61 = vpop.permute.xlu1 %935 }
 0x371   :  { %v945_v30 = vsel %vm201_vm1, %v938_v53, %v937_v25  ;;  %v944_v32 = vperm.slane %v936_v61, %v3529_v20  ;;  %v1379_v37 = vpop.permute.xlu2 %1378 }
 0x372   :  { %v946_v2 = vsel %vm3537_vm9, %v939_v21, %v945_v30  ;;  %v1389_v28 = vperm.slane %v1379_v37, %v3529_v20  ;;  %vm3552_vm9 = vmmov %vm3545_vm0 }
 0x376   :  { %v924_v8 = vpop.permute.xlu0 %923 }
 0x377   :  { %v940_v41 = vperm.slane %v924_v8, %v3529_v20 }
 0x379   :  { %v947_v18 = vsel %vm3538_vm5, %v940_v41, %v946_v2  ;;  %vm3553_vm5 = vmmov %vm3546_vm6 }
 0x37a   :  { %v948_v55 = vsel %vm3539_vm8, %v941_v40, %v947_v18  ;;  %vm3555_vm8 = vmmov %vm3541_vm7  ;;  %v80_v40 = vld [vmem:[%s3442_s4] sm:$0xff] }
 0x37b   :  { %v949_v62 = vsel %vm3540_vm2, %v942_v56, %v948_v55  ;;  %549 = vmatpush.msra.mxu1 %v80_v40  ;;  %994 = vmatpush.msra.mxu3 %v80_v40 }
 0x37c   :  { %v1367_v6 = vpop.permute.xlu1 %1366  ;;  %1440 = vmatpush.msrb.mxu2 %v80_v40 }
 0x37d   :  { %v1385_v45 = vperm.slane %v1367_v6, %v3529_v20  ;;  %v1810_v7 = vpop.permute.xlu2 %1809  ;;  %1879 = vmatpush.msrb.mxu1 %v3336_v38  ;;  %v1867_v6 = vld [vmem:[#allocation4 + $0x18] sm:$0xff] }
 0x37e   :  { %v1830_v43 = vperm.slane %v1810_v7, %v3529_v20 }
 0x37f   :  { %1880 = vmatpush.msrb.mxu1 %v3341_v63 }
 0x381   :  { %v933_v19 = vpop.permute.xlu0 %932  ;;  %1881 = vmatpush.msrb.mxu1 %v85_v47 }
 0x382   :  { %v943_v35 = vperm.slane %v933_v19, %v3529_v20  ;;  %v975_v19 = vld [vmem:[#allocation4 + $0x8] sm:$0xff] }
 0x383   :  { %1882 = vmatpush.msrb.mxu1 %v84_v15 }
 0x384   :  { %v950_v14 = vsel %vm3541_vm7, %v943_v35, %v949_v62  ;;  %v1376_v57 = vpop.permute.xlu1 %1375  ;;  %vm3557_vm7 = vmmov %vm3543_vm4 }
 0x385   :  { %v951_v29 = vsel %vm3542_vm10, %v944_v32, %v950_v14  ;;  %v1388_v54 = vperm.slane %v1376_v57, %v3529_v20  ;;  %1883 = vmatpush.msrb.mxu1 %v83_v34  ;;  %v1421_v14 = vld [vmem:[#allocation4 + $0x10] sm:$0xff] }
 0x386   :  { %1925 = vmatmul.msk.f32.vlgmr.msra.gmra.mxu2 %vm3543_vm4, %v951_v29  ;;  %v1819_v48 = vpop.permute.xlu2 %1818 }
 0x387   :  { %v1833_v25 = vperm.slane %v1819_v48, %v3529_v20  ;;  %1884 = vmatpush.msrb.mxu1 %v82_v44 }
 0x389   :  { %1885 = vmatpush.msrb.mxu1 %v81_v12 }
 0x38b   :  { %v1364_v31 = vpop.permute.xlu0 %1363  ;;  %1886 = vmatpush.msrb.mxu1 %v80_v40 }
 0x38c   :  { %v1384_v4 = vperm.slane %v1364_v31, %v3529_v20 }
 0x38e   :  { %v1391_v23 = vsel %vm201_vm1, %v1384_v4, %v1383_v3 }
 0x38f   :  { %v1392_v13 = vsel %vm3544_vm11, %v1385_v45, %v1391_v23  ;;  %v1947_v23 = vld [vmem:[%s3443_s5] ss:$0 sm:$0xff] }
 0x390   :  { %v1393_v59 = vsel %vm3545_vm0, %v1386_v50, %v1392_v13 }
 0x391   :  { %v1807_v17 = vpop.permute.xlu1 %1806 }
 0x392   :  { %v1829_v10 = vperm.slane %v1807_v17, %v3529_v20  ;;  %v1828_v42 = vpop.permute.xlu2 %1827 }
 0x393   :  { %v1836_v21 = vperm.slane %v1828_v42, %v3529_v20 }
 0x394   :  { %v1837_v9 = vsel %vm201_vm1, %v1830_v43, %v1829_v10  ;;  %vm3554_vm1 = vmmov %vm3540_vm2 }
 0x395   :  { %vm3556_vm2 = vmmov %vm3542_vm10  ;;  %vm3558_vm10 = vcmask 523264  }
 0x396   :  { %vm3559_vm4 = vmmov %vm3558_vm10 }
 0x397   :  { %v1373_v49 = vpop.permute.xlu0 %1372  ;;  %vm3560_vm11 = vmmov %vm3559_vm4 }
 0x398   :  { %v1387_v39 = vperm.slane %v1373_v49, %v3529_v20  ;;  %vm3561_vm0 = vmmov %vm3559_vm4 }
 0x39a   :  { %v1394_v5 = vsel %vm3546_vm6, %v1387_v39, %v1393_v59  ;;  %vm3562_vm6 = vmmov %vm3561_vm0 }
 0x39b   :  { %v1395_v27 = vsel %vm3547_vm3, %v1388_v54, %v1394_v5  ;;  %vm3563_vm3 = vmmov %vm3561_vm0 }
 0x39c   :  { %v1396_v52 = vsel %vm3548_vm12, %v1389_v28, %v1395_v27  ;;  %v1816_v22 = vpop.permute.xlu1 %1815  ;;  %vm3564_vm12 = vmmov %vm3561_vm0 }
 0x39d   :  { %v1832_v58 = vperm.slane %v1816_v22, %v3529_v20 }
 0x3a2   :  { %v1382_v46 = vpop.permute.xlu0 %1381 }
 0x3a3   :  { %v1390_v0 = vperm.slane %v1382_v46, %v3529_v20 }
 0x3a5   :  { %v1397_v1 = vsel %vm3549_vm13, %v1390_v0, %v1396_v52  ;;  %vm3565_vm13 = vmmov %vm3561_vm0 }
 0x3a6   :  { %1927 = vmatmul.msk.f32.vlgmr.msrb.gmra.mxu0 %vm3550_vm14, %v1397_v1  ;;  %vm3566_vm14 = vmmov %vm3557_vm7 }
 0x3a7   :  { %v1825_v11 = vpop.permute.xlu1 %1824 }
 0x3a8   :  { %v1835_v30 = vperm.slane %v1825_v11, %v3529_v20 }
 0x3ae   :  { %v1813_v60 = vpop.permute.xlu0 %1812 }
 0x3af   :  { %v1831_v51 = vperm.slane %v1813_v60, %v3529_v20 }
 0x3b1   :  { %v1838_v33 = vsel %vm3551_vm15, %v1831_v51, %v1837_v9  ;;  %vm3567_vm15 = vmmov %vm3557_vm7 }
 0x3b2   :  { %v1839_v26 = vsel %vm3552_vm9, %v1832_v58, %v1838_v33  ;;  %vm3568_vm9 = vmmov %vm3557_vm7 }
 0x3b3   :  { %v1840_v41 = vsel %vm3553_vm5, %v1833_v25, %v1839_v26  ;;  %vm3569_vm5 = vmmov %vm3557_vm7 }
 0x3b6   :  { %v1822_v8 = vpop.permute.xlu0 %1821 }
 0x3b7   :  { %v1834_v53 = vperm.slane %v1822_v8, %v3529_v20  ;;  %v527_v20 = vld [vmem:[#allocation4] sm:$0xff] }
 0x3b9   :  { %v1841_v2 = vsel %vm3554_vm1, %v1834_v53, %v1840_v41  ;;  %vm3570_vm1 = vmmov %vm3569_vm5 }
 0x3ba   :  { %v1842_v18 = vsel %vm3555_vm8, %v1835_v30, %v1841_v2  ;;  %vm3571_vm8 = vmmov %vm3570_vm1 }
 0x3bb   :  { %v1843_v36 = vsel %vm3556_vm2, %v1836_v21, %v1842_v18  ;;  %vm3572_vm2 = vmmov %vm3570_vm1  ;;  %v572_v18 = vld [vmem:[#allocation6] sm:$0xff] }
 0x3bc   :  { %1929 = vmatmul.msk.f32.vlgmr.msra.gmra.mxu0 %vm3557_vm7, %v1843_v36  ;;  %vm3573_vm7 = vmmov %vm3570_vm1 }
 0x3e7   :  { %v524_v61 = vpop.f32.mrf.mxu0 }
 0x3e8   :  { %v554_v55 = vmul.f32 %v527_v20, %v524_v61  ;;  %1924 = vmatmul.msk.f32.vlgmr.msra.gmra.mxu1 %vm3558_vm10, %v524_v61  ;;  %vm3574_vm10 = vmmov %vm3570_vm1 }
 0x3ea   :  { %v555_v56 = vsel %vm3559_vm4, %v554_v55, 0.0  ;;  %vm3575_vm4 = vmmov %vm3570_vm1 }
 0x3eb   :  { %556 = vadd.xlane.f32.xlu0 %v555_v56 }
 0x409   :  { %v971_v35 = vpop.f32.mrf.mxu2 }
 0x40a   :  { %v999_v32 = vmul.f32 %v975_v19, %v971_v35  ;;  %1926 = vmatmul.msk.f32.vlgmr.msra.gmra.mxu3 %vm3560_vm11, %v971_v35  ;;  %v1018_v35 = vld [vmem:[#allocation6 + $0x8] sm:$0xff]  ;;  %vm3576_vm11 = vmmov %vm3570_vm1 }
 0x40c   :  { %v1000_v62 = vsel %vm3561_vm0, %v999_v32, 0.0  ;;  %vm3577_vm0 = vmmov %vm3570_vm1 }
 0x40d   :  { %1001 = vadd.xlane.f32.xlu1 %v1000_v62 }
 0x423   :  { %v1417_v29 = vpop.f32.mrf.mxu0 }
 0x424   :  { %v1445_v24 = vmul.f32 %v1421_v14, %v1417_v29  ;;  %1928 = vmatmul.msk.f32.vlgmr.msrb.gmra.mxu2 %vm3562_vm6, %v1417_v29  ;;  %vm577_vm6 = vcmask 7168  }
 0x426   :  { %v1446_v31 = vsel %vm3563_vm3, %v1445_v24, 0.0  ;;  %vm1023_vm3 = vcmask 15368  }
 0x427   :  { %1447 = vadd.xlane.f32.xlu2 %v1446_v31 }
 0x439   :  { %v1863_v16 = vpop.f32.mrf.mxu0 }
 0x43a   :  { %v1891_v4 = vmul.f32 %v1867_v6, %v1863_v16  ;;  %1930 = vmatmul.msk.f32.vlgmr.msrb.gmra.mxu1 %vm3564_vm12, %v1863_v16  ;;  %v1464_v16 = vld [vmem:[#allocation6 + $0x10] sm:$0xff]  ;;  %vm1469_vm12 = vcmask 23568  }
 0x43c   :  { %v1892_v3 = vsel %vm3565_vm13, %v1891_v4, 0.0  ;;  %vm1915_vm13 = vcmask 31768  }
 0x43d   :  { %1893 = vadd.xlane.f32.xlu0 %v1892_v3 }
 0x45e   :  { %v557_v57 = vpop.xlane.xlu0 %556 }
 0x465   :  { %v551_v49 = vpop.f32.mrf.mxu1 }
 0x466   :  { %v552_v45 = vadd.f32 %v1947_v23, %v551_v49 }
 0x468   :  { %v558_v37 = vadd.f32 %v557_v57, %v552_v45 }
 0x46a   :  { %v559_v13 = vsel %vm3566_vm14, %v558_v37, -inf }
 0x46b   :  { %560 = vmax.xlane.f32.xlu1 %v559_v13  ;;  %v1910_v13 = vld [vmem:[#allocation6 + $0x18] sm:$0xff] }
 0x480   :  { %v1002_v59 = vpop.xlane.xlu1 %1001 }
 0x48d   :  { %v996_v39 = vpop.f32.mrf.mxu3 }
 0x48e   :  { %v997_v50 = vadd.f32 %v1947_v23, %v996_v39 }
 0x490   :  { %v1003_v38 = vadd.f32 %v1002_v59, %v997_v50 }
 0x492   :  { %v1004_v63 = vsel %vm3567_vm15, %v1003_v38, -inf }
 0x493   :  { %1005 = vmax.xlane.f32.xlu1 %v1004_v63 }
 0x49a   :  { %v1448_v47 = vpop.xlane.xlu2 %1447 }
 0x4a7   :  { %v1442_v5 = vpop.f32.mrf.mxu2 }
 0x4a8   :  { %v1443_v54 = vadd.f32 %v1947_v23, %v1442_v5 }
 0x4aa   :  { %v3406_v27 = vadd.f32 %v1448_v47, %v1443_v54 }
 0x4ac   :  { %v1450_v15 = vsel %vm3568_vm9, %v3406_v27, -inf }
 0x4ad   :  { %1451 = vmax.xlane.f32.xlu1 %v1450_v15 }
 0x4b0   :  { %v1894_v46 = vpop.xlane.xlu0 %1893 }
 0x4b7   :  { %v1888_v28 = vpop.f32.mrf.mxu1 }
 0x4b8   :  { %v1889_v17 = vadd.f32 %v1947_v23, %v1888_v28 }
 0x4ba   :  { %v3410_v7 = vadd.f32 %v1894_v46, %v1889_v17 }
 0x4bc   :  { %v1896_v0 = vsel %vm3569_vm5, %v3410_v7, -inf }
 0x4bd   :  { %1897 = vmax.xlane.f32.xlu2 %v1896_v0 }
 0x4de   :  { %v561_v34 = vpop.xlane.xlu1 %560 }
 0x4df   :  { %v562_v52 = vsub.f32 %v558_v37, %v561_v34 }
 0x4e1   :  { %v563_v1 = vmul.f32 1.442695, %v562_v52 }
 0x4e3   :  { %2076 = vpow2.f32 %v563_v1 }
 0x4e9   :  { %v2077_v44 = vpop.eup %2076 }
 0x4ea   :  { %v565_v12 = vsel %vm3570_vm1, %v2077_v44, 0.0 }
 0x4eb   :  { %566 = vadd.xlane.f32.xlu2 %v565_v12 }
 0x506   :  { %v1006_v22 = vpop.xlane.xlu1 %1005 }
 0x507   :  { %v1007_v48 = vsub.f32 %v1003_v38, %v1006_v22 }
 0x509   :  { %v1008_v10 = vmul.f32 1.442695, %v1007_v48 }
 0x50b   :  { %2078 = vpow2.f32 %v1008_v10 }
 0x511   :  { %v2079_v60 = vpop.eup %2078 }
 0x512   :  { %v1010_v43 = vsel %vm3571_vm8, %v2079_v60, 0.0 }
 0x513   :  { %1011 = vadd.xlane.f32.xlu2 %v1010_v43 }
 0x520   :  { %v1452_v51 = vpop.xlane.xlu1 %1451 }
 0x521   :  { %v1453_v9 = vsub.f32 %v3406_v27, %v1452_v51 }
 0x523   :  { %v1454_v33 = vmul.f32 1.442695, %v1453_v9 }
 0x525   :  { %2080 = vpow2.f32 %v1454_v33 }
 0x52b   :  { %v2081_v58 = vpop.eup %2080 }
 0x52c   :  { %v1456_v11 = vsel %vm3572_vm2, %v2081_v58, 0.0 }
 0x52d   :  { %1457 = vadd.xlane.f32.xlu0 %v1456_v11 }
 0x530   :  { %v1898_v26 = vpop.xlane.xlu2 %1897 }
 0x531   :  { %v1899_v25 = vsub.f32 %v3410_v7, %v1898_v26 }
 0x533   :  { %v1900_v42 = vmul.f32 1.442695, %v1899_v25 }
 0x535   :  { %2082 = vpow2.f32 %v1900_v42 }
 0x53b   :  { %v2083_v8 = vpop.eup %2082 }
 0x53c   :  { %v1902_v53 = vsel %vm3573_vm7, %v2083_v8, 0.0 }
 0x53d   :  { %1903 = vadd.xlane.f32.xlu2 %v1902_v53 }
 0x55e   :  { %v567_v30 = vpop.xlane.xlu2 %566 }
 0x55f   :  { %2084 = vlog2.f32 %v567_v30 }
 0x565   :  { %v2085_v41 = vpop.eup %2084 }
 0x566   :  { %v569_v21 = vmul.f32 0.6931472, %v2085_v41 }
 0x568   :  { %v570_v2 = vadd.f32 %v569_v21, %v561_v34 }
 0x56a   :  { %v571_v36 = vsub.f32 %v558_v37, %v570_v2 }
 0x56c   :  { %v573_v40 = vmul.f32 %v572_v18, %v571_v36 }
 0x56e   :  { %v574_v20 = vsel %vm3574_vm10, %v573_v40, 0.0 }
 0x56f   :  { %575 = vadd.xlane.f32.xlu0 %v574_v20 }
 0x586   :  { %v1012_v61 = vpop.xlane.xlu2 %1011 }
 0x587   :  { %2086 = vlog2.f32 %v1012_v61 }
 0x58d   :  { %v2087_v55 = vpop.eup %2086 }
 0x58e   :  { %v1014_v56 = vmul.f32 0.6931472, %v2087_v55 }
 0x590   :  { %v1015_v19 = vadd.f32 %v1014_v56, %v1006_v22 }
 0x592   :  { %v1016_v32 = vsub.f32 %v1003_v38, %v1015_v19 }
 0x594   :  { %v1019_v62 = vmul.f32 %v1018_v35, %v1016_v32 }
 0x596   :  { %v1020_v14 = vsel %vm3575_vm4, %v1019_v62, 0.0 }
 0x597   :  { %1021 = vadd.xlane.f32.xlu0 %v1020_v14 }
 0x5a0   :  { %v1458_v29 = vpop.xlane.xlu0 %1457 }
 0x5a1   :  { %2088 = vlog2.f32 %v1458_v29 }
 0x5a7   :  { %v2089_v24 = vpop.eup %2088 }
 0x5a8   :  { %v1460_v31 = vmul.f32 0.6931472, %v2089_v24 }
 0x5aa   :  { %v1461_v6 = vadd.f32 %v1460_v31, %v1452_v51 }
 0x5ac   :  { %v1462_v4 = vsub.f32 %v3406_v27, %v1461_v6 }
 0x5ae   :  { %v1465_v3 = vmul.f32 %v1464_v16, %v1462_v4 }
 0x5b0   :  { %v1466_v23 = vsel %vm3576_vm11, %v1465_v3, 0.0  ;;  %v1904_v49 = vpop.xlane.xlu2 %1903 }
 0x5b1   :  { %1467 = vadd.xlane.f32.xlu1 %v1466_v23  ;;  %2090 = vlog2.f32 %v1904_v49 }
 0x5b7   :  { %v2091_v45 = vpop.eup %2090 }
 0x5b8   :  { %v1906_v57 = vmul.f32 0.6931472, %v2091_v45 }
 0x5ba   :  { %v1907_v37 = vadd.f32 %v1906_v57, %v1898_v26 }
 0x5bc   :  { %v1908_v39 = vsub.f32 %v3410_v7, %v1907_v37 }
 0x5be   :  { %v1911_v50 = vmul.f32 %v1910_v13, %v1908_v39 }
 0x5c0   :  { %v1912_v59 = vsel %vm3577_vm0, %v1911_v50, 0.0 }
 0x5c1   :  { %1913 = vadd.xlane.f32.xlu0 %v1912_v59 }
 0x5e2   :  { %v576_v38 = vpop.xlane.xlu0 %575 }
 0x5e3   :  { %578 = vst.msk [vmem:[%s3445_s7] sm:$0xff] %vm577_vm6, %v576_v38 }
 0x60a   :  { %v1022_v63 = vpop.xlane.xlu0 %1021 }
 0x60b   :  { %1024 = vst.msk [vmem:[%s3445_s7] sm:$0xff] %vm1023_vm3, %v1022_v63 }
 0x624   :  { %v1468_v5 = vpop.xlane.xlu1 %1467 }
 0x625   :  { %1470 = vst.msk [vmem:[%s3445_s7] sm:$0xff] %vm1469_vm12, %v1468_v5 }
 0x634   :  { %v1914_v54 = vpop.xlane.xlu0 %1913 }
 0x635   :  { %1916 = vst.msk [vmem:[%s3445_s7] sm:$0xff] %vm1915_vm13, %v1914_v54 }
 0x636   :  { %1921 = vsyncpa [#allocation3], 1 }
 0x637   :  { %1922 = vsyncpa [#allocation5], 1 }

</bundles_post_ra>
